<compile_context>
chip_gen: v7x
topology: tpu7x:2x2x1
jax: 0.10.0
libtpu: 0.0.40
codegen_flags: <defaults>
</compile_context>

<pallas_src>
import math

import jax
import jax.numpy as jnp
from jax.experimental import pallas as pl
from jax.experimental.pallas import tpu as pltpu


# ---------------------------------------------------------------------------
# Kernel
# ---------------------------------------------------------------------------
def _make_lstm_kernel(num_layers, seq_len, hidden, tb):
    H = hidden
    T = seq_len

    def kernel(*refs):
        # refs = [x, (w_ih, w_hh, b) * L, w_fc, b_fc, out, pre, (seq if L > 1)]
        n_in = 3 + 3 * num_layers
        x_ref = refs[0]
        layer_refs = refs[1:1 + 3 * num_layers]
        w_fc_ref = refs[n_in - 2]
        b_fc_ref = refs[n_in - 1]
        out_ref = refs[n_in]
        pre_ref = refs[n_in + 1]                                  # VMEM (T*tb, 4H) f32
        seq_ref = refs[n_in + 2] if num_layers > 1 else None      # VMEM (T*tb, H)  f32

        h_last = None
        for l in range(num_layers):
            w_ih = layer_refs[3 * l][...]          # bf16 (in_l, 4H), cols [i,f,o,g]
            w_hh = layer_refs[3 * l + 1][...]      # bf16 (H, 4H),    cols [i,f,o,g]
            b = layer_refs[3 * l + 2][...]         # f32  (1, 4H) fused bias

            # ---- hoisted input GEMM: all T timesteps in one MXU pass ----
            if l == 0:
                inp = x_ref[...]                               # bf16 (T*tb, I)
            else:
                inp = seq_ref[...].astype(jnp.bfloat16)        # (T*tb, H)
            pre_ref[...] = (
                jnp.dot(inp, w_ih, preferred_element_type=jnp.float32) + b)

            last_layer = (l == num_layers - 1)

            def step(t, carry):
                h, c = carry                                   # f32 (tb, H)
                off = pl.multiple_of(t * tb, tb)
                gates = pre_ref[pl.ds(off, tb), :] + jnp.dot(
                    h.astype(jnp.bfloat16), w_hh,
                    preferred_element_type=jnp.float32)        # f32 (tb, 4H)
                # gate order [i, f, o, g] (permuted in the wrapper):
                # one merged sigmoid over 3H lanes + one tanh over H lanes.
                sig = jax.nn.sigmoid(gates[:, :3 * H])
                g_g = jnp.tanh(gates[:, 3 * H:])
                i_g = sig[:, 0 * H:1 * H]
                f_g = sig[:, 1 * H:2 * H]
                o_g = sig[:, 2 * H:3 * H]
                c_new = f_g * c + i_g * g_g
                h_new = o_g * jnp.tanh(c_new)
                if not last_layer:
                    seq_ref[pl.ds(off, tb), :] = h_new         # feeds next layer
                return h_new, c_new

            h0 = jnp.zeros((tb, H), jnp.float32)
            c0 = jnp.zeros((tb, H), jnp.float32)
            unroll = True if T <= 16 else 4
            h_last, _ = jax.lax.fori_loop(0, T, step, (h0, c0), unroll=unroll)

        # ---- classifier head on the last timestep of the last layer ----
        logits = jnp.dot(h_last.astype(jnp.bfloat16), w_fc_ref[...],
                         preferred_element_type=jnp.float32) + b_fc_ref[...]
        out_ref[...] = jax.nn.sigmoid(logits)

    return kernel


# ---------------------------------------------------------------------------
# Wrapper
# ---------------------------------------------------------------------------
def _reorder_gate_rows(w, H):
    """PyTorch gate row order [i, f, g, o] -> kernel order [i, f, o, g]."""
    i, f, g, o = w[:H], w[H:2 * H], w[2 * H:3 * H], w[3 * H:]
    return jnp.concatenate([i, f, o, g], axis=0)


def _pick_tb(b_pad):
    """b_pad is a multiple of 8. Prefer >= 2 grid steps (v7x has 2 TensorCores),
    then the largest batch tile (bigger M for the recurrent matmul / VPU work)."""
    candidates = (256, 128, 64, 32, 16, 8)
    for c in candidates:
        if b_pad % c == 0 and b_pad // c >= 2:
            return c
    for c in candidates:
        if b_pad % c == 0:
            return c
    return b_pad


def lstm_classifier_forward(x, params, *, tb=None):
    """x: (B, T, input_size) f32. Returns (B, num_classes) f32."""
    B, T, I = x.shape
    H = params["hidden_size"]
    L = params["num_layers"]
    C = params["num_classes"]
    C_pad = ((C + 127) // 128) * 128              # lane-dense classifier output

    # Pad batch to a sublane multiple, then pick the batch tile.
    B_pad = ((B + 7) // 8) * 8
    if tb is None:
        tb = _pick_tb(B_pad)
    assert B_pad % tb == 0 and tb % 8 == 0
    num_tiles = B_pad // tb
    grid = (num_tiles,)

    # Wrapper-side layout plumbing: pad batch, group into batch tiles, flatten
    # each tile time-major -> (num_tiles, T*tb, I) bf16 so the kernel's per-layer
    # input GEMM is one 2-D (T*tb, in_l) slab and every per-step slice
    # pre[t*tb:(t+1)*tb] is sublane-aligned.
    x_pad = jnp.zeros((B_pad, T, I), x.dtype).at[:B].set(x)
    x_tiles = (x_pad.reshape(num_tiles, tb, T, I)
                    .transpose(0, 2, 1, 3)
                    .reshape(num_tiles, T * tb, I)
                    .astype(jnp.bfloat16))

    const2d = lambda i: (0, 0)                    # weights: VMEM-resident
    kin = [x_tiles]
    in_specs = [pl.BlockSpec((None, T * tb, I), lambda i: (i, 0, 0))]

    for (w_ih, w_hh, b_ih, b_hh) in params["layers"]:
        w_ih_p = _reorder_gate_rows(w_ih, H).T.astype(jnp.bfloat16)     # (in_l, 4H)
        w_hh_p = _reorder_gate_rows(w_hh, H).T.astype(jnp.bfloat16)     # (H, 4H)
        b_p = _reorder_gate_rows((b_ih + b_hh).reshape(4 * H, 1), H)    # fused bias
        b_p = b_p.reshape(1, 4 * H).astype(jnp.float32)
        kin += [w_ih_p, w_hh_p, b_p]
        in_specs += [pl.BlockSpec(w_ih_p.shape, const2d),
                     pl.BlockSpec(w_hh_p.shape, const2d),
                     pl.BlockSpec(b_p.shape, const2d)]

    w_fc_pad = jnp.zeros((H, C_pad), jnp.bfloat16).at[:, :C].set(
        params["w_fc"].T.astype(jnp.bfloat16))
    b_fc_pad = jnp.zeros((1, C_pad), jnp.float32).at[:, :C].set(params["b_fc"])
    kin += [w_fc_pad, b_fc_pad]
    in_specs += [pl.BlockSpec((H, C_pad), const2d),
                 pl.BlockSpec((1, C_pad), const2d)]

    out_spec = pl.BlockSpec((tb, C_pad), lambda i: (i, 0))
    out_shape = jax.ShapeDtypeStruct((B_pad, C_pad), jnp.float32)

    scratch_shapes = [pltpu.VMEM((T * tb, 4 * H), jnp.float32)]         # pre-gates
    if L > 1:
        scratch_shapes.append(pltpu.VMEM((T * tb, H), jnp.float32))     # layer output

    # Per-tile VMEM budget (double-buffered inputs/output + scratch).
    est = 2 * (T * tb * I * 2)
    in_dim = I
    for _ in range(L):
        est += 2 * ((in_dim * 4 * H + H * 4 * H) * 2 + 4 * H * 4)
        in_dim = H
    est += 2 * (H * C_pad * 2 + C_pad * 4) + 2 * (tb * C_pad * 4)
    est += T * tb * 4 * H * 4 + (T * tb * H * 4 if L > 1 else 0)
    vmem_limit = int(min(max(2 * est, 32 * 2**20), 64 * 2**20))
    # TODO(synk): for very long T on v7x (64 MiB VMEM) add a trailing "arbitrary"
    # time-chunk grid axis and carry h/c in scratch across it (stream x in chunks).

    # Advisory cost estimate for XLA scheduling.
    flops, in_dim = 0, I
    for _ in range(L):
        flops += 2 * B_pad * T * (in_dim + H) * 4 * H
        in_dim = H
    flops += 2 * B_pad * H * C_pad
    transcendentals = B_pad * (T * L * 5 * H + C_pad)
    bytes_accessed = sum(int(a.size) * a.dtype.itemsize for a in kin) + B_pad * C_pad * 4

    kernel = _make_lstm_kernel(L, T, H, tb)

    out_padded = pl.pallas_call(
        kernel,
        out_shape=out_shape,
        grid_spec=pltpu.PrefetchScalarGridSpec(
            num_scalar_prefetch=0,
            grid=grid,
            in_specs=in_specs,
            out_specs=out_spec,
            scratch_shapes=scratch_shapes,
        ),
        compiler_params=pltpu.CompilerParams(
            dimension_semantics=("parallel",),
            vmem_limit_bytes=vmem_limit),
        cost_estimate=pl.CostEstimate(
            flops=int(flops),
            transcendentals=int(transcendentals),
            bytes_accessed=int(bytes_accessed)),
    )(*kin)

    return out_padded[:B, :C]


# ---------------------------------------------------------------------------
# Params (PyTorch nn.LSTM / nn.Linear layout) + pure-JAX reference
# ---------------------------------------------------------------------------
def init_params(key, input_size, hidden_size, num_layers, num_classes):
    k = 1.0 / math.sqrt(hidden_size)
    keys = jax.random.split(key, 4 * num_layers + 2)
    layers, idx = [], 0
    for l in range(num_layers):
        in_dim = input_size if l == 0 else hidden_size
        w_ih = jax.random.uniform(keys[idx], (4 * hidden_size, in_dim), jnp.float32, -k, k); idx += 1
        w_hh = jax.random.uniform(keys[idx], (4 * hidden_size, hidden_size), jnp.float32, -k, k); idx += 1
        b_ih = jax.random.uniform(keys[idx], (4 * hidden_size,), jnp.float32, -k, k); idx += 1
        b_hh = jax.random.uniform(keys[idx], (4 * hidden_size,), jnp.float32, -k, k); idx += 1
        layers.append((w_ih, w_hh, b_ih, b_hh))
    w_fc = jax.random.uniform(keys[idx], (num_classes, hidden_size), jnp.float32, -k, k); idx += 1
    b_fc = jax.random.uniform(keys[idx], (num_classes,), jnp.float32, -k, k)
    return dict(hidden_size=hidden_size, num_layers=num_layers,
                num_classes=num_classes, input_size=input_size,
                layers=layers, w_fc=w_fc, b_fc=b_fc)


def lstm_classifier_ref(x, params):
    """Pure-JAX (f32) reference matching torch nn.LSTM(batch_first=True) + fc + sigmoid."""
    B, T, _ = x.shape
    H = params["hidden_size"]
    seq = x
    for (w_ih, w_hh, b_ih, b_hh) in params["layers"]:
        h = jnp.zeros((B, H), jnp.float32)
        c = jnp.zeros((B, H), jnp.float32)
        outs = []
        for t in range(T):
            gates = seq[:, t, :] @ w_ih.T + b_ih + h @ w_hh.T + b_hh
            i = jax.nn.sigmoid(gates[:, :H])
            f = jax.nn.sigmoid(gates[:, H:2 * H])
            g = jnp.tanh(gates[:, 2 * H:3 * H])
            o = jax.nn.sigmoid(gates[:, 3 * H:])
            c = f * c + i * g
            h = o * jnp.tanh(c)
            outs.append(h)
        seq = jnp.stack(outs, axis=1)
    logits = seq[:, -1, :] @ params["w_fc"].T + params["b_fc"]
    return jax.nn.sigmoid(logits)


# ---------------------------------------------------------------------------
# Demo / correctness check
# ---------------------------------------------------------------------------
if __name__ == "__main__":
    B, T = 2, 8
    input_size, hidden_size, num_layers, num_classes = 16, 32, 2, 4

    key = jax.random.PRNGKey(0)
    k_x, k_p = jax.random.split(key)
    x = jax.random.normal(k_x, (B, T, input_size), jnp.float32)
    params = init_params(k_p, input_size, hidden_size, num_layers, num_classes)

    out = lstm_classifier_forward(x, params)
    out = jax.block_until_ready(out)

    ref = lstm_classifier_ref(x, params)
    assert out.shape == ref.shape == (B, num_classes)
    # bf16 MXU operands -> relaxed tolerance vs the f32 reference
    assert jnp.allclose(out, ref, atol=3e-2, rtol=3e-2), \
        f"max abs diff = {jnp.max(jnp.abs(out - ref))}"

    print("KERNEL_OK")
</pallas_src>

<mosaic_0001>
module attributes {stable_mosaic.version = 11 : i64} {
  func.func @kernel(%arg0: i32, %arg1: memref<1x64x16xbf16, #tpu.memory_space<vmem>>, %arg2: memref<16x128xbf16, #tpu.memory_space<vmem>>, %arg3: memref<32x128xbf16, #tpu.memory_space<vmem>>, %arg4: memref<1x128xf32, #tpu.memory_space<vmem>>, %arg5: memref<32x128xbf16, #tpu.memory_space<vmem>>, %arg6: memref<32x128xbf16, #tpu.memory_space<vmem>>, %arg7: memref<1x128xf32, #tpu.memory_space<vmem>>, %arg8: memref<32x128xbf16, #tpu.memory_space<vmem>>, %arg9: memref<1x128xf32, #tpu.memory_space<vmem>>, %arg10: memref<8x128xf32, #tpu.memory_space<vmem>>, %arg11: memref<64x128xf32, #tpu.memory_space<vmem>>, %arg12: memref<64x32xf32, #tpu.memory_space<vmem>>) attributes {dimension_semantics = [#tpu.dimension_semantics<parallel>], iteration_bounds = array<i64: 1>, scalar_prefetch = 0 : i64, scratch_operands = 2 : i64, tpu.core_type = #tpu.core_type<tc>, window_params = [{transform_indices = @transform_0, window_bounds = array<i64: 1, 64, 16>}, {pipeline_mode = #tpu.pipeline_mode<synchronous>, transform_indices = @transform_1, window_bounds = array<i64: 16, 128>}, {pipeline_mode = #tpu.pipeline_mode<synchronous>, transform_indices = @transform_2, window_bounds = array<i64: 32, 128>}, {pipeline_mode = #tpu.pipeline_mode<synchronous>, transform_indices = @transform_3, window_bounds = array<i64: 1, 128>}, {pipeline_mode = #tpu.pipeline_mode<synchronous>, transform_indices = @transform_4, window_bounds = array<i64: 32, 128>}, {pipeline_mode = #tpu.pipeline_mode<synchronous>, transform_indices = @transform_5, window_bounds = array<i64: 32, 128>}, {pipeline_mode = #tpu.pipeline_mode<synchronous>, transform_indices = @transform_6, window_bounds = array<i64: 1, 128>}, {pipeline_mode = #tpu.pipeline_mode<synchronous>, transform_indices = @transform_7, window_bounds = array<i64: 32, 128>}, {pipeline_mode = #tpu.pipeline_mode<synchronous>, transform_indices = @transform_8, window_bounds = array<i64: 1, 128>}, {transform_indices = @transform_9, window_bounds = array<i64: 8, 128>}]} {
    %c0 = arith.constant 0 : index
    %c0_0 = arith.constant 0 : index
    %0 = vector.load %arg2[%c0, %c0_0] : memref<16x128xbf16, #tpu.memory_space<vmem>>, vector<16x128xbf16>
    %c0_1 = arith.constant 0 : index
    %c0_2 = arith.constant 0 : index
    %1 = vector.load %arg3[%c0_1, %c0_2] : memref<32x128xbf16, #tpu.memory_space<vmem>>, vector<32x128xbf16>
    %c0_3 = arith.constant 0 : index
    %c0_4 = arith.constant 0 : index
    %2 = vector.load %arg4[%c0_3, %c0_4] : memref<1x128xf32, #tpu.memory_space<vmem>>, vector<1x128xf32>
    %c0_5 = arith.constant 0 : index
    %c0_6 = arith.constant 0 : index
    %c0_7 = arith.constant 0 : index
    %3 = vector.load %arg1[%c0_5, %c0_6, %c0_7] : memref<1x64x16xbf16, #tpu.memory_space<vmem>>, vector<1x64x16xbf16>
    %4 = vector.shape_cast %3 : vector<1x64x16xbf16> to vector<64x16xbf16>
    %cst = arith.constant dense<0.000000e+00> : vector<64x128xf32>
    %5 = tpu.matmul %4, %0, %cst {dimension_numbers = #tpu.dot_dimension_numbers<[1], [0], [0], [1], [0, 0, 1, 1], [], []>} : vector<64x16xbf16>, vector<16x128xbf16>, vector<64x128xf32> -> vector<64x128xf32>
    %6 = vector.broadcast %2 : vector<1x128xf32> to vector<64x128xf32>
    %7 = arith.addf %5, %6 : vector<64x128xf32>
    %c0_8 = arith.constant 0 : index
    %c0_9 = arith.constant 0 : index
    %8 = vector.load %arg11[%c0_8, %c0_9] : memref<64x128xf32, #tpu.memory_space<vmem>>, vector<64x128xf32>
    tpu.vector_store %arg11[%c0_8, %c0_9], %7 {strides = array<i32>} : memref<64x128xf32, #tpu.memory_space<vmem>>, vector<64x128xf32>,
    %cst_10 = arith.constant 0.000000e+00 : f32
    %9 = vector.broadcast %cst_10 : f32 to vector<8x32xf32>
    %cst_11 = arith.constant 0.000000e+00 : f32
    %10 = vector.broadcast %cst_11 : f32 to vector<8x32xf32>
    %c0_i32 = arith.constant 0 : i32
    %c8_i32 = arith.constant 8 : i32
    %11 = arith.muli %c0_i32, %c8_i32 : i32
    %12 = tpu.assume_multiple %11, 8 : i32
    %13 = arith.index_cast %12 : i32 to index
    %c0_12 = arith.constant 0 : index
    %14 = vector.load %arg11[%13, %c0_12] : memref<64x128xf32, #tpu.memory_space<vmem>>, vector<8x128xf32>
    %15 = arith.truncf %9 : vector<8x32xf32> to vector<8x32xbf16>
    %cst_13 = arith.constant dense<0.000000e+00> : vector<8x128xf32>
    %16 = tpu.matmul %15, %1, %cst_13 {dimension_numbers = #tpu.dot_dimension_numbers<[1], [0], [0], [1], [0, 0, 1, 1], [], []>} : vector<8x32xbf16>, vector<32x128xbf16>, vector<8x128xf32> -> vector<8x128xf32>
    %17 = arith.addf %14, %16 : vector<8x128xf32>
    %18 = vector.extract_strided_slice %17 {offsets = [0, 0], sizes = [8, 96], strides = [1, 1]} : vector<8x128xf32> to vector<8x96xf32>
    %19 = arith.negf %18 : vector<8x96xf32>
    %20 = math.exp %19 : vector<8x96xf32>
    %cst_14 = arith.constant 1.000000e+00 : f32
    %21 = vector.broadcast %cst_14 : f32 to vector<8x96xf32>
    %22 = arith.addf %21, %20 : vector<8x96xf32>
    %23 = arith.divf %21, %22 : vector<8x96xf32>
    %24 = vector.extract_strided_slice %17 {offsets = [0, 96], sizes = [8, 32], strides = [1, 1]} : vector<8x128xf32> to vector<8x32xf32>
    %25 = math.tanh %24 : vector<8x32xf32>
    %26 = vector.extract_strided_slice %23 {offsets = [0, 0], sizes = [8, 32], strides = [1, 1]} : vector<8x96xf32> to vector<8x32xf32>
    %27 = vector.extract_strided_slice %23 {offsets = [0, 32], sizes = [8, 32], strides = [1, 1]} : vector<8x96xf32> to vector<8x32xf32>
    %28 = vector.extract_strided_slice %23 {offsets = [0, 64], sizes = [8, 32], strides = [1, 1]} : vector<8x96xf32> to vector<8x32xf32>
    %29 = arith.mulf %27, %10 : vector<8x32xf32>
    %30 = arith.mulf %26, %25 : vector<8x32xf32>
    %31 = arith.addf %29, %30 : vector<8x32xf32>
    %32 = math.tanh %31 : vector<8x32xf32>
    %33 = arith.mulf %28, %32 : vector<8x32xf32>
    %34 = arith.index_cast %12 : i32 to index
    %c0_15 = arith.constant 0 : index
    %35 = vector.load %arg12[%34, %c0_15] : memref<64x32xf32, #tpu.memory_space<vmem>>, vector<8x32xf32>
    tpu.vector_store %arg12[%34, %c0_15], %33 {strides = array<i32>} : memref<64x32xf32, #tpu.memory_space<vmem>>, vector<8x32xf32>,
    %c1_i32 = arith.constant 1 : i32
    %c8_i32_16 = arith.constant 8 : i32
    %36 = arith.muli %c1_i32, %c8_i32_16 : i32
    %37 = tpu.assume_multiple %36, 8 : i32
    %38 = arith.index_cast %37 : i32 to index
    %c0_17 = arith.constant 0 : index
    %39 = vector.load %arg11[%38, %c0_17] : memref<64x128xf32, #tpu.memory_space<vmem>>, vector<8x128xf32>
    %40 = arith.truncf %33 : vector<8x32xf32> to vector<8x32xbf16>
    %cst_18 = arith.constant dense<0.000000e+00> : vector<8x128xf32>
    %41 = tpu.matmul %40, %1, %cst_18 {dimension_numbers = #tpu.dot_dimension_numbers<[1], [0], [0], [1], [0, 0, 1, 1], [], []>} : vector<8x32xbf16>, vector<32x128xbf16>, vector<8x128xf32> -> vector<8x128xf32>
    %42 = arith.addf %39, %41 : vector<8x128xf32>
    %43 = vector.extract_strided_slice %42 {offsets = [0, 0], sizes = [8, 96], strides = [1, 1]} : vector<8x128xf32> to vector<8x96xf32>
    %44 = arith.negf %43 : vector<8x96xf32>
    %45 = math.exp %44 : vector<8x96xf32>
    %cst_19 = arith.constant 1.000000e+00 : f32
    %46 = vector.broadcast %cst_19 : f32 to vector<8x96xf32>
    %47 = arith.addf %46, %45 : vector<8x96xf32>
    %48 = arith.divf %46, %47 : vector<8x96xf32>
    %49 = vector.extract_strided_slice %42 {offsets = [0, 96], sizes = [8, 32], strides = [1, 1]} : vector<8x128xf32> to vector<8x32xf32>
    %50 = math.tanh %49 : vector<8x32xf32>
    %51 = vector.extract_strided_slice %48 {offsets = [0, 0], sizes = [8, 32], strides = [1, 1]} : vector<8x96xf32> to vector<8x32xf32>
    %52 = vector.extract_strided_slice %48 {offsets = [0, 32], sizes = [8, 32], strides = [1, 1]} : vector<8x96xf32> to vector<8x32xf32>
    %53 = vector.extract_strided_slice %48 {offsets = [0, 64], sizes = [8, 32], strides = [1, 1]} : vector<8x96xf32> to vector<8x32xf32>
    %54 = arith.mulf %52, %31 : vector<8x32xf32>
    %55 = arith.mulf %51, %50 : vector<8x32xf32>
    %56 = arith.addf %54, %55 : vector<8x32xf32>
    %57 = math.tanh %56 : vector<8x32xf32>
    %58 = arith.mulf %53, %57 : vector<8x32xf32>
    %59 = arith.index_cast %37 : i32 to index
    %c0_20 = arith.constant 0 : index
    %60 = vector.load %arg12[%59, %c0_20] : memref<64x32xf32, #tpu.memory_space<vmem>>, vector<8x32xf32>
    tpu.vector_store %arg12[%59, %c0_20], %58 {strides = array<i32>} : memref<64x32xf32, #tpu.memory_space<vmem>>, vector<8x32xf32>,
    %c2_i32 = arith.constant 2 : i32
    %c8_i32_21 = arith.constant 8 : i32
    %61 = arith.muli %c2_i32, %c8_i32_21 : i32
    %62 = tpu.assume_multiple %61, 8 : i32
    %63 = arith.index_cast %62 : i32 to index
    %c0_22 = arith.constant 0 : index
    %64 = vector.load %arg11[%63, %c0_22] : memref<64x128xf32, #tpu.memory_space<vmem>>, vector<8x128xf32>
    %65 = arith.truncf %58 : vector<8x32xf32> to vector<8x32xbf16>
    %cst_23 = arith.constant dense<0.000000e+00> : vector<8x128xf32>
    %66 = tpu.matmul %65, %1, %cst_23 {dimension_numbers = #tpu.dot_dimension_numbers<[1], [0], [0], [1], [0, 0, 1, 1], [], []>} : vector<8x32xbf16>, vector<32x128xbf16>, vector<8x128xf32> -> vector<8x128xf32>
    %67 = arith.addf %64, %66 : vector<8x128xf32>
    %68 = vector.extract_strided_slice %67 {offsets = [0, 0], sizes = [8, 96], strides = [1, 1]} : vector<8x128xf32> to vector<8x96xf32>
    %69 = arith.negf %68 : vector<8x96xf32>
    %70 = math.exp %69 : vector<8x96xf32>
    %cst_24 = arith.constant 1.000000e+00 : f32
    %71 = vector.broadcast %cst_24 : f32 to vector<8x96xf32>
    %72 = arith.addf %71, %70 : vector<8x96xf32>
    %73 = arith.divf %71, %72 : vector<8x96xf32>
    %74 = vector.extract_strided_slice %67 {offsets = [0, 96], sizes = [8, 32], strides = [1, 1]} : vector<8x128xf32> to vector<8x32xf32>
    %75 = math.tanh %74 : vector<8x32xf32>
    %76 = vector.extract_strided_slice %73 {offsets = [0, 0], sizes = [8, 32], strides = [1, 1]} : vector<8x96xf32> to vector<8x32xf32>
    %77 = vector.extract_strided_slice %73 {offsets = [0, 32], sizes = [8, 32], strides = [1, 1]} : vector<8x96xf32> to vector<8x32xf32>
    %78 = vector.extract_strided_slice %73 {offsets = [0, 64], sizes = [8, 32], strides = [1, 1]} : vector<8x96xf32> to vector<8x32xf32>
    %79 = arith.mulf %77, %56 : vector<8x32xf32>
    %80 = arith.mulf %76, %75 : vector<8x32xf32>
    %81 = arith.addf %79, %80 : vector<8x32xf32>
    %82 = math.tanh %81 : vector<8x32xf32>
    %83 = arith.mulf %78, %82 : vector<8x32xf32>
    %84 = arith.index_cast %62 : i32 to index
    %c0_25 = arith.constant 0 : index
    %85 = vector.load %arg12[%84, %c0_25] : memref<64x32xf32, #tpu.memory_space<vmem>>, vector<8x32xf32>
    tpu.vector_store %arg12[%84, %c0_25], %83 {strides = array<i32>} : memref<64x32xf32, #tpu.memory_space<vmem>>, vector<8x32xf32>,
    %c3_i32 = arith.constant 3 : i32
    %c8_i32_26 = arith.constant 8 : i32
    %86 = arith.muli %c3_i32, %c8_i32_26 : i32
    %87 = tpu.assume_multiple %86, 8 : i32
    %88 = arith.index_cast %87 : i32 to index
    %c0_27 = arith.constant 0 : index
    %89 = vector.load %arg11[%88, %c0_27] : memref<64x128xf32, #tpu.memory_space<vmem>>, vector<8x128xf32>
    %90 = arith.truncf %83 : vector<8x32xf32> to vector<8x32xbf16>
    %cst_28 = arith.constant dense<0.000000e+00> : vector<8x128xf32>
    %91 = tpu.matmul %90, %1, %cst_28 {dimension_numbers = #tpu.dot_dimension_numbers<[1], [0], [0], [1], [0, 0, 1, 1], [], []>} : vector<8x32xbf16>, vector<32x128xbf16>, vector<8x128xf32> -> vector<8x128xf32>
    %92 = arith.addf %89, %91 : vector<8x128xf32>
    %93 = vector.extract_strided_slice %92 {offsets = [0, 0], sizes = [8, 96], strides = [1, 1]} : vector<8x128xf32> to vector<8x96xf32>
    %94 = arith.negf %93 : vector<8x96xf32>
    %95 = math.exp %94 : vector<8x96xf32>
    %cst_29 = arith.constant 1.000000e+00 : f32
    %96 = vector.broadcast %cst_29 : f32 to vector<8x96xf32>
    %97 = arith.addf %96, %95 : vector<8x96xf32>
    %98 = arith.divf %96, %97 : vector<8x96xf32>
    %99 = vector.extract_strided_slice %92 {offsets = [0, 96], sizes = [8, 32], strides = [1, 1]} : vector<8x128xf32> to vector<8x32xf32>
    %100 = math.tanh %99 : vector<8x32xf32>
    %101 = vector.extract_strided_slice %98 {offsets = [0, 0], sizes = [8, 32], strides = [1, 1]} : vector<8x96xf32> to vector<8x32xf32>
    %102 = vector.extract_strided_slice %98 {offsets = [0, 32], sizes = [8, 32], strides = [1, 1]} : vector<8x96xf32> to vector<8x32xf32>
    %103 = vector.extract_strided_slice %98 {offsets = [0, 64], sizes = [8, 32], strides = [1, 1]} : vector<8x96xf32> to vector<8x32xf32>
    %104 = arith.mulf %102, %81 : vector<8x32xf32>
    %105 = arith.mulf %101, %100 : vector<8x32xf32>
    %106 = arith.addf %104, %105 : vector<8x32xf32>
    %107 = math.tanh %106 : vector<8x32xf32>
    %108 = arith.mulf %103, %107 : vector<8x32xf32>
    %109 = arith.index_cast %87 : i32 to index
    %c0_30 = arith.constant 0 : index
    %110 = vector.load %arg12[%109, %c0_30] : memref<64x32xf32, #tpu.memory_space<vmem>>, vector<8x32xf32>
    tpu.vector_store %arg12[%109, %c0_30], %108 {strides = array<i32>} : memref<64x32xf32, #tpu.memory_space<vmem>>, vector<8x32xf32>,
    %c4_i32 = arith.constant 4 : i32
    %c8_i32_31 = arith.constant 8 : i32
    %111 = arith.muli %c4_i32, %c8_i32_31 : i32
    %112 = tpu.assume_multiple %111, 8 : i32
    %113 = arith.index_cast %112 : i32 to index
    %c0_32 = arith.constant 0 : index
    %114 = vector.load %arg11[%113, %c0_32] : memref<64x128xf32, #tpu.memory_space<vmem>>, vector<8x128xf32>
    %115 = arith.truncf %108 : vector<8x32xf32> to vector<8x32xbf16>
    %cst_33 = arith.constant dense<0.000000e+00> : vector<8x128xf32>
    %116 = tpu.matmul %115, %1, %cst_33 {dimension_numbers = #tpu.dot_dimension_numbers<[1], [0], [0], [1], [0, 0, 1, 1], [], []>} : vector<8x32xbf16>, vector<32x128xbf16>, vector<8x128xf32> -> vector<8x128xf32>
    %117 = arith.addf %114, %116 : vector<8x128xf32>
    %118 = vector.extract_strided_slice %117 {offsets = [0, 0], sizes = [8, 96], strides = [1, 1]} : vector<8x128xf32> to vector<8x96xf32>
    %119 = arith.negf %118 : vector<8x96xf32>
    %120 = math.exp %119 : vector<8x96xf32>
    %cst_34 = arith.constant 1.000000e+00 : f32
    %121 = vector.broadcast %cst_34 : f32 to vector<8x96xf32>
    %122 = arith.addf %121, %120 : vector<8x96xf32>
    %123 = arith.divf %121, %122 : vector<8x96xf32>
    %124 = vector.extract_strided_slice %117 {offsets = [0, 96], sizes = [8, 32], strides = [1, 1]} : vector<8x128xf32> to vector<8x32xf32>
    %125 = math.tanh %124 : vector<8x32xf32>
    %126 = vector.extract_strided_slice %123 {offsets = [0, 0], sizes = [8, 32], strides = [1, 1]} : vector<8x96xf32> to vector<8x32xf32>
    %127 = vector.extract_strided_slice %123 {offsets = [0, 32], sizes = [8, 32], strides = [1, 1]} : vector<8x96xf32> to vector<8x32xf32>
    %128 = vector.extract_strided_slice %123 {offsets = [0, 64], sizes = [8, 32], strides = [1, 1]} : vector<8x96xf32> to vector<8x32xf32>
    %129 = arith.mulf %127, %106 : vector<8x32xf32>
    %130 = arith.mulf %126, %125 : vector<8x32xf32>
    %131 = arith.addf %129, %130 : vector<8x32xf32>
    %132 = math.tanh %131 : vector<8x32xf32>
    %133 = arith.mulf %128, %132 : vector<8x32xf32>
    %134 = arith.index_cast %112 : i32 to index
    %c0_35 = arith.constant 0 : index
    %135 = vector.load %arg12[%134, %c0_35] : memref<64x32xf32, #tpu.memory_space<vmem>>, vector<8x32xf32>
    tpu.vector_store %arg12[%134, %c0_35], %133 {strides = array<i32>} : memref<64x32xf32, #tpu.memory_space<vmem>>, vector<8x32xf32>,
    %c5_i32 = arith.constant 5 : i32
    %c8_i32_36 = arith.constant 8 : i32
    %136 = arith.muli %c5_i32, %c8_i32_36 : i32
    %137 = tpu.assume_multiple %136, 8 : i32
    %138 = arith.index_cast %137 : i32 to index
    %c0_37 = arith.constant 0 : index
    %139 = vector.load %arg11[%138, %c0_37] : memref<64x128xf32, #tpu.memory_space<vmem>>, vector<8x128xf32>
    %140 = arith.truncf %133 : vector<8x32xf32> to vector<8x32xbf16>
    %cst_38 = arith.constant dense<0.000000e+00> : vector<8x128xf32>
    %141 = tpu.matmul %140, %1, %cst_38 {dimension_numbers = #tpu.dot_dimension_numbers<[1], [0], [0], [1], [0, 0, 1, 1], [], []>} : vector<8x32xbf16>, vector<32x128xbf16>, vector<8x128xf32> -> vector<8x128xf32>
    %142 = arith.addf %139, %141 : vector<8x128xf32>
    %143 = vector.extract_strided_slice %142 {offsets = [0, 0], sizes = [8, 96], strides = [1, 1]} : vector<8x128xf32> to vector<8x96xf32>
    %144 = arith.negf %143 : vector<8x96xf32>
    %145 = math.exp %144 : vector<8x96xf32>
    %cst_39 = arith.constant 1.000000e+00 : f32
    %146 = vector.broadcast %cst_39 : f32 to vector<8x96xf32>
    %147 = arith.addf %146, %145 : vector<8x96xf32>
    %148 = arith.divf %146, %147 : vector<8x96xf32>
    %149 = vector.extract_strided_slice %142 {offsets = [0, 96], sizes = [8, 32], strides = [1, 1]} : vector<8x128xf32> to vector<8x32xf32>
    %150 = math.tanh %149 : vector<8x32xf32>
    %151 = vector.extract_strided_slice %148 {offsets = [0, 0], sizes = [8, 32], strides = [1, 1]} : vector<8x96xf32> to vector<8x32xf32>
    %152 = vector.extract_strided_slice %148 {offsets = [0, 32], sizes = [8, 32], strides = [1, 1]} : vector<8x96xf32> to vector<8x32xf32>
    %153 = vector.extract_strided_slice %148 {offsets = [0, 64], sizes = [8, 32], strides = [1, 1]} : vector<8x96xf32> to vector<8x32xf32>
    %154 = arith.mulf %152, %131 : vector<8x32xf32>
    %155 = arith.mulf %151, %150 : vector<8x32xf32>
    %156 = arith.addf %154, %155 : vector<8x32xf32>
    %157 = math.tanh %156 : vector<8x32xf32>
    %158 = arith.mulf %153, %157 : vector<8x32xf32>
    %159 = arith.index_cast %137 : i32 to index
    %c0_40 = arith.constant 0 : index
    %160 = vector.load %arg12[%159, %c0_40] : memref<64x32xf32, #tpu.memory_space<vmem>>, vector<8x32xf32>
    tpu.vector_store %arg12[%159, %c0_40], %158 {strides = array<i32>} : memref<64x32xf32, #tpu.memory_space<vmem>>, vector<8x32xf32>,
    %c6_i32 = arith.constant 6 : i32
    %c8_i32_41 = arith.constant 8 : i32
    %161 = arith.muli %c6_i32, %c8_i32_41 : i32
    %162 = tpu.assume_multiple %161, 8 : i32
    %163 = arith.index_cast %162 : i32 to index
    %c0_42 = arith.constant 0 : index
    %164 = vector.load %arg11[%163, %c0_42] : memref<64x128xf32, #tpu.memory_space<vmem>>, vector<8x128xf32>
    %165 = arith.truncf %158 : vector<8x32xf32> to vector<8x32xbf16>
    %cst_43 = arith.constant dense<0.000000e+00> : vector<8x128xf32>
    %166 = tpu.matmul %165, %1, %cst_43 {dimension_numbers = #tpu.dot_dimension_numbers<[1], [0], [0], [1], [0, 0, 1, 1], [], []>} : vector<8x32xbf16>, vector<32x128xbf16>, vector<8x128xf32> -> vector<8x128xf32>
    %167 = arith.addf %164, %166 : vector<8x128xf32>
    %168 = vector.extract_strided_slice %167 {offsets = [0, 0], sizes = [8, 96], strides = [1, 1]} : vector<8x128xf32> to vector<8x96xf32>
    %169 = arith.negf %168 : vector<8x96xf32>
    %170 = math.exp %169 : vector<8x96xf32>
    %cst_44 = arith.constant 1.000000e+00 : f32
    %171 = vector.broadcast %cst_44 : f32 to vector<8x96xf32>
    %172 = arith.addf %171, %170 : vector<8x96xf32>
    %173 = arith.divf %171, %172 : vector<8x96xf32>
    %174 = vector.extract_strided_slice %167 {offsets = [0, 96], sizes = [8, 32], strides = [1, 1]} : vector<8x128xf32> to vector<8x32xf32>
    %175 = math.tanh %174 : vector<8x32xf32>
    %176 = vector.extract_strided_slice %173 {offsets = [0, 0], sizes = [8, 32], strides = [1, 1]} : vector<8x96xf32> to vector<8x32xf32>
    %177 = vector.extract_strided_slice %173 {offsets = [0, 32], sizes = [8, 32], strides = [1, 1]} : vector<8x96xf32> to vector<8x32xf32>
    %178 = vector.extract_strided_slice %173 {offsets = [0, 64], sizes = [8, 32], strides = [1, 1]} : vector<8x96xf32> to vector<8x32xf32>
    %179 = arith.mulf %177, %156 : vector<8x32xf32>
    %180 = arith.mulf %176, %175 : vector<8x32xf32>
    %181 = arith.addf %179, %180 : vector<8x32xf32>
    %182 = math.tanh %181 : vector<8x32xf32>
    %183 = arith.mulf %178, %182 : vector<8x32xf32>
    %184 = arith.index_cast %162 : i32 to index
    %c0_45 = arith.constant 0 : index
    %185 = vector.load %arg12[%184, %c0_45] : memref<64x32xf32, #tpu.memory_space<vmem>>, vector<8x32xf32>
    tpu.vector_store %arg12[%184, %c0_45], %183 {strides = array<i32>} : memref<64x32xf32, #tpu.memory_space<vmem>>, vector<8x32xf32>,
    %c7_i32 = arith.constant 7 : i32
    %c8_i32_46 = arith.constant 8 : i32
    %186 = arith.muli %c7_i32, %c8_i32_46 : i32
    %187 = tpu.assume_multiple %186, 8 : i32
    %188 = arith.index_cast %187 : i32 to index
    %c0_47 = arith.constant 0 : index
    %189 = vector.load %arg11[%188, %c0_47] : memref<64x128xf32, #tpu.memory_space<vmem>>, vector<8x128xf32>
    %190 = arith.truncf %183 : vector<8x32xf32> to vector<8x32xbf16>
    %cst_48 = arith.constant dense<0.000000e+00> : vector<8x128xf32>
    %191 = tpu.matmul %190, %1, %cst_48 {dimension_numbers = #tpu.dot_dimension_numbers<[1], [0], [0], [1], [0, 0, 1, 1], [], []>} : vector<8x32xbf16>, vector<32x128xbf16>, vector<8x128xf32> -> vector<8x128xf32>
    %192 = arith.addf %189, %191 : vector<8x128xf32>
    %193 = vector.extract_strided_slice %192 {offsets = [0, 0], sizes = [8, 96], strides = [1, 1]} : vector<8x128xf32> to vector<8x96xf32>
    %194 = arith.negf %193 : vector<8x96xf32>
    %195 = math.exp %194 : vector<8x96xf32>
    %cst_49 = arith.constant 1.000000e+00 : f32
    %196 = vector.broadcast %cst_49 : f32 to vector<8x96xf32>
    %197 = arith.addf %196, %195 : vector<8x96xf32>
    %198 = arith.divf %196, %197 : vector<8x96xf32>
    %199 = vector.extract_strided_slice %192 {offsets = [0, 96], sizes = [8, 32], strides = [1, 1]} : vector<8x128xf32> to vector<8x32xf32>
    %200 = math.tanh %199 : vector<8x32xf32>
    %201 = vector.extract_strided_slice %198 {offsets = [0, 0], sizes = [8, 32], strides = [1, 1]} : vector<8x96xf32> to vector<8x32xf32>
    %202 = vector.extract_strided_slice %198 {offsets = [0, 32], sizes = [8, 32], strides = [1, 1]} : vector<8x96xf32> to vector<8x32xf32>
    %203 = vector.extract_strided_slice %198 {offsets = [0, 64], sizes = [8, 32], strides = [1, 1]} : vector<8x96xf32> to vector<8x32xf32>
    %204 = arith.mulf %202, %181 : vector<8x32xf32>
    %205 = arith.mulf %201, %200 : vector<8x32xf32>
    %206 = arith.addf %204, %205 : vector<8x32xf32>
    %207 = math.tanh %206 : vector<8x32xf32>
    %208 = arith.mulf %203, %207 : vector<8x32xf32>
    %209 = arith.index_cast %187 : i32 to index
    %c0_50 = arith.constant 0 : index
    %210 = vector.load %arg12[%209, %c0_50] : memref<64x32xf32, #tpu.memory_space<vmem>>, vector<8x32xf32>
    tpu.vector_store %arg12[%209, %c0_50], %208 {strides = array<i32>} : memref<64x32xf32, #tpu.memory_space<vmem>>, vector<8x32xf32>,
    %c8_i32_51 = arith.constant 8 : i32
    %c0_52 = arith.constant 0 : index
    %c0_53 = arith.constant 0 : index
    %211 = vector.load %arg5[%c0_52, %c0_53] : memref<32x128xbf16, #tpu.memory_space<vmem>>, vector<32x128xbf16>
    %c0_54 = arith.constant 0 : index
    %c0_55 = arith.constant 0 : index
    %212 = vector.load %arg6[%c0_54, %c0_55] : memref<32x128xbf16, #tpu.memory_space<vmem>>, vector<32x128xbf16>
    %c0_56 = arith.constant 0 : index
    %c0_57 = arith.constant 0 : index
    %213 = vector.load %arg7[%c0_56, %c0_57] : memref<1x128xf32, #tpu.memory_space<vmem>>, vector<1x128xf32>
    %c0_58 = arith.constant 0 : index
    %c0_59 = arith.constant 0 : index
    %214 = vector.load %arg12[%c0_58, %c0_59] : memref<64x32xf32, #tpu.memory_space<vmem>>, vector<64x32xf32>
    %215 = arith.truncf %214 : vector<64x32xf32> to vector<64x32xbf16>
    %cst_60 = arith.constant dense<0.000000e+00> : vector<64x128xf32>
    %216 = tpu.matmul %215, %211, %cst_60 {dimension_numbers = #tpu.dot_dimension_numbers<[1], [0], [0], [1], [0, 0, 1, 1], [], []>} : vector<64x32xbf16>, vector<32x128xbf16>, vector<64x128xf32> -> vector<64x128xf32>
    %217 = vector.broadcast %213 : vector<1x128xf32> to vector<64x128xf32>
    %218 = arith.addf %216, %217 : vector<64x128xf32>
    %c0_61 = arith.constant 0 : index
    %c0_62 = arith.constant 0 : index
    %219 = vector.load %arg11[%c0_61, %c0_62] : memref<64x128xf32, #tpu.memory_space<vmem>>, vector<64x128xf32>
    tpu.vector_store %arg11[%c0_61, %c0_62], %218 {strides = array<i32>} : memref<64x128xf32, #tpu.memory_space<vmem>>, vector<64x128xf32>,
    %cst_63 = arith.constant 0.000000e+00 : f32
    %220 = vector.broadcast %cst_63 : f32 to vector<8x32xf32>
    %cst_64 = arith.constant 0.000000e+00 : f32
    %221 = vector.broadcast %cst_64 : f32 to vector<8x32xf32>
    %c0_i32_65 = arith.constant 0 : i32
    %c8_i32_66 = arith.constant 8 : i32
    %222 = arith.muli %c0_i32_65, %c8_i32_66 : i32
    %223 = tpu.assume_multiple %222, 8 : i32
    %224 = arith.index_cast %223 : i32 to index
    %c0_67 = arith.constant 0 : index
    %225 = vector.load %arg11[%224, %c0_67] : memref<64x128xf32, #tpu.memory_space<vmem>>, vector<8x128xf32>
    %226 = arith.truncf %220 : vector<8x32xf32> to vector<8x32xbf16>
    %cst_68 = arith.constant dense<0.000000e+00> : vector<8x128xf32>
    %227 = tpu.matmul %226, %212, %cst_68 {dimension_numbers = #tpu.dot_dimension_numbers<[1], [0], [0], [1], [0, 0, 1, 1], [], []>} : vector<8x32xbf16>, vector<32x128xbf16>, vector<8x128xf32> -> vector<8x128xf32>
    %228 = arith.addf %225, %227 : vector<8x128xf32>
    %229 = vector.extract_strided_slice %228 {offsets = [0, 0], sizes = [8, 96], strides = [1, 1]} : vector<8x128xf32> to vector<8x96xf32>
    %230 = arith.negf %229 : vector<8x96xf32>
    %231 = math.exp %230 : vector<8x96xf32>
    %cst_69 = arith.constant 1.000000e+00 : f32
    %232 = vector.broadcast %cst_69 : f32 to vector<8x96xf32>
    %233 = arith.addf %232, %231 : vector<8x96xf32>
    %234 = arith.divf %232, %233 : vector<8x96xf32>
    %235 = vector.extract_strided_slice %228 {offsets = [0, 96], sizes = [8, 32], strides = [1, 1]} : vector<8x128xf32> to vector<8x32xf32>
    %236 = math.tanh %235 : vector<8x32xf32>
    %237 = vector.extract_strided_slice %234 {offsets = [0, 0], sizes = [8, 32], strides = [1, 1]} : vector<8x96xf32> to vector<8x32xf32>
    %238 = vector.extract_strided_slice %234 {offsets = [0, 32], sizes = [8, 32], strides = [1, 1]} : vector<8x96xf32> to vector<8x32xf32>
    %239 = vector.extract_strided_slice %234 {offsets = [0, 64], sizes = [8, 32], strides = [1, 1]} : vector<8x96xf32> to vector<8x32xf32>
    %240 = arith.mulf %238, %221 : vector<8x32xf32>
    %241 = arith.mulf %237, %236 : vector<8x32xf32>
    %242 = arith.addf %240, %241 : vector<8x32xf32>
    %243 = math.tanh %242 : vector<8x32xf32>
    %244 = arith.mulf %239, %243 : vector<8x32xf32>
    %c1_i32_70 = arith.constant 1 : i32
    %c8_i32_71 = arith.constant 8 : i32
    %245 = arith.muli %c1_i32_70, %c8_i32_71 : i32
    %246 = tpu.assume_multiple %245, 8 : i32
    %247 = arith.index_cast %246 : i32 to index
    %c0_72 = arith.constant 0 : index
    %248 = vector.load %arg11[%247, %c0_72] : memref<64x128xf32, #tpu.memory_space<vmem>>, vector<8x128xf32>
    %249 = arith.truncf %244 : vector<8x32xf32> to vector<8x32xbf16>
    %cst_73 = arith.constant dense<0.000000e+00> : vector<8x128xf32>
    %250 = tpu.matmul %249, %212, %cst_73 {dimension_numbers = #tpu.dot_dimension_numbers<[1], [0], [0], [1], [0, 0, 1, 1], [], []>} : vector<8x32xbf16>, vector<32x128xbf16>, vector<8x128xf32> -> vector<8x128xf32>
    %251 = arith.addf %248, %250 : vector<8x128xf32>
    %252 = vector.extract_strided_slice %251 {offsets = [0, 0], sizes = [8, 96], strides = [1, 1]} : vector<8x128xf32> to vector<8x96xf32>
    %253 = arith.negf %252 : vector<8x96xf32>
    %254 = math.exp %253 : vector<8x96xf32>
    %cst_74 = arith.constant 1.000000e+00 : f32
    %255 = vector.broadcast %cst_74 : f32 to vector<8x96xf32>
    %256 = arith.addf %255, %254 : vector<8x96xf32>
    %257 = arith.divf %255, %256 : vector<8x96xf32>
    %258 = vector.extract_strided_slice %251 {offsets = [0, 96], sizes = [8, 32], strides = [1, 1]} : vector<8x128xf32> to vector<8x32xf32>
    %259 = math.tanh %258 : vector<8x32xf32>
    %260 = vector.extract_strided_slice %257 {offsets = [0, 0], sizes = [8, 32], strides = [1, 1]} : vector<8x96xf32> to vector<8x32xf32>
    %261 = vector.extract_strided_slice %257 {offsets = [0, 32], sizes = [8, 32], strides = [1, 1]} : vector<8x96xf32> to vector<8x32xf32>
    %262 = vector.extract_strided_slice %257 {offsets = [0, 64], sizes = [8, 32], strides = [1, 1]} : vector<8x96xf32> to vector<8x32xf32>
    %263 = arith.mulf %261, %242 : vector<8x32xf32>
    %264 = arith.mulf %260, %259 : vector<8x32xf32>
    %265 = arith.addf %263, %264 : vector<8x32xf32>
    %266 = math.tanh %265 : vector<8x32xf32>
    %267 = arith.mulf %262, %266 : vector<8x32xf32>
    %c2_i32_75 = arith.constant 2 : i32
    %c8_i32_76 = arith.constant 8 : i32
    %268 = arith.muli %c2_i32_75, %c8_i32_76 : i32
    %269 = tpu.assume_multiple %268, 8 : i32
    %270 = arith.index_cast %269 : i32 to index
    %c0_77 = arith.constant 0 : index
    %271 = vector.load %arg11[%270, %c0_77] : memref<64x128xf32, #tpu.memory_space<vmem>>, vector<8x128xf32>
    %272 = arith.truncf %267 : vector<8x32xf32> to vector<8x32xbf16>
    %cst_78 = arith.constant dense<0.000000e+00> : vector<8x128xf32>
    %273 = tpu.matmul %272, %212, %cst_78 {dimension_numbers = #tpu.dot_dimension_numbers<[1], [0], [0], [1], [0, 0, 1, 1], [], []>} : vector<8x32xbf16>, vector<32x128xbf16>, vector<8x128xf32> -> vector<8x128xf32>
    %274 = arith.addf %271, %273 : vector<8x128xf32>
    %275 = vector.extract_strided_slice %274 {offsets = [0, 0], sizes = [8, 96], strides = [1, 1]} : vector<8x128xf32> to vector<8x96xf32>
    %276 = arith.negf %275 : vector<8x96xf32>
    %277 = math.exp %276 : vector<8x96xf32>
    %cst_79 = arith.constant 1.000000e+00 : f32
    %278 = vector.broadcast %cst_79 : f32 to vector<8x96xf32>
    %279 = arith.addf %278, %277 : vector<8x96xf32>
    %280 = arith.divf %278, %279 : vector<8x96xf32>
    %281 = vector.extract_strided_slice %274 {offsets = [0, 96], sizes = [8, 32], strides = [1, 1]} : vector<8x128xf32> to vector<8x32xf32>
    %282 = math.tanh %281 : vector<8x32xf32>
    %283 = vector.extract_strided_slice %280 {offsets = [0, 0], sizes = [8, 32], strides = [1, 1]} : vector<8x96xf32> to vector<8x32xf32>
    %284 = vector.extract_strided_slice %280 {offsets = [0, 32], sizes = [8, 32], strides = [1, 1]} : vector<8x96xf32> to vector<8x32xf32>
    %285 = vector.extract_strided_slice %280 {offsets = [0, 64], sizes = [8, 32], strides = [1, 1]} : vector<8x96xf32> to vector<8x32xf32>
    %286 = arith.mulf %284, %265 : vector<8x32xf32>
    %287 = arith.mulf %283, %282 : vector<8x32xf32>
    %288 = arith.addf %286, %287 : vector<8x32xf32>
    %289 = math.tanh %288 : vector<8x32xf32>
    %290 = arith.mulf %285, %289 : vector<8x32xf32>
    %c3_i32_80 = arith.constant 3 : i32
    %c8_i32_81 = arith.constant 8 : i32
    %291 = arith.muli %c3_i32_80, %c8_i32_81 : i32
    %292 = tpu.assume_multiple %291, 8 : i32
    %293 = arith.index_cast %292 : i32 to index
    %c0_82 = arith.constant 0 : index
    %294 = vector.load %arg11[%293, %c0_82] : memref<64x128xf32, #tpu.memory_space<vmem>>, vector<8x128xf32>
    %295 = arith.truncf %290 : vector<8x32xf32> to vector<8x32xbf16>
    %cst_83 = arith.constant dense<0.000000e+00> : vector<8x128xf32>
    %296 = tpu.matmul %295, %212, %cst_83 {dimension_numbers = #tpu.dot_dimension_numbers<[1], [0], [0], [1], [0, 0, 1, 1], [], []>} : vector<8x32xbf16>, vector<32x128xbf16>, vector<8x128xf32> -> vector<8x128xf32>
    %297 = arith.addf %294, %296 : vector<8x128xf32>
    %298 = vector.extract_strided_slice %297 {offsets = [0, 0], sizes = [8, 96], strides = [1, 1]} : vector<8x128xf32> to vector<8x96xf32>
    %299 = arith.negf %298 : vector<8x96xf32>
    %300 = math.exp %299 : vector<8x96xf32>
    %cst_84 = arith.constant 1.000000e+00 : f32
    %301 = vector.broadcast %cst_84 : f32 to vector<8x96xf32>
    %302 = arith.addf %301, %300 : vector<8x96xf32>
    %303 = arith.divf %301, %302 : vector<8x96xf32>
    %304 = vector.extract_strided_slice %297 {offsets = [0, 96], sizes = [8, 32], strides = [1, 1]} : vector<8x128xf32> to vector<8x32xf32>
    %305 = math.tanh %304 : vector<8x32xf32>
    %306 = vector.extract_strided_slice %303 {offsets = [0, 0], sizes = [8, 32], strides = [1, 1]} : vector<8x96xf32> to vector<8x32xf32>
    %307 = vector.extract_strided_slice %303 {offsets = [0, 32], sizes = [8, 32], strides = [1, 1]} : vector<8x96xf32> to vector<8x32xf32>
    %308 = vector.extract_strided_slice %303 {offsets = [0, 64], sizes = [8, 32], strides = [1, 1]} : vector<8x96xf32> to vector<8x32xf32>
    %309 = arith.mulf %307, %288 : vector<8x32xf32>
    %310 = arith.mulf %306, %305 : vector<8x32xf32>
    %311 = arith.addf %309, %310 : vector<8x32xf32>
    %312 = math.tanh %311 : vector<8x32xf32>
    %313 = arith.mulf %308, %312 : vector<8x32xf32>
    %c4_i32_85 = arith.constant 4 : i32
    %c8_i32_86 = arith.constant 8 : i32
    %314 = arith.muli %c4_i32_85, %c8_i32_86 : i32
    %315 = tpu.assume_multiple %314, 8 : i32
    %316 = arith.index_cast %315 : i32 to index
    %c0_87 = arith.constant 0 : index
    %317 = vector.load %arg11[%316, %c0_87] : memref<64x128xf32, #tpu.memory_space<vmem>>, vector<8x128xf32>
    %318 = arith.truncf %313 : vector<8x32xf32> to vector<8x32xbf16>
    %cst_88 = arith.constant dense<0.000000e+00> : vector<8x128xf32>
    %319 = tpu.matmul %318, %212, %cst_88 {dimension_numbers = #tpu.dot_dimension_numbers<[1], [0], [0], [1], [0, 0, 1, 1], [], []>} : vector<8x32xbf16>, vector<32x128xbf16>, vector<8x128xf32> -> vector<8x128xf32>
    %320 = arith.addf %317, %319 : vector<8x128xf32>
    %321 = vector.extract_strided_slice %320 {offsets = [0, 0], sizes = [8, 96], strides = [1, 1]} : vector<8x128xf32> to vector<8x96xf32>
    %322 = arith.negf %321 : vector<8x96xf32>
    %323 = math.exp %322 : vector<8x96xf32>
    %cst_89 = arith.constant 1.000000e+00 : f32
    %324 = vector.broadcast %cst_89 : f32 to vector<8x96xf32>
    %325 = arith.addf %324, %323 : vector<8x96xf32>
    %326 = arith.divf %324, %325 : vector<8x96xf32>
    %327 = vector.extract_strided_slice %320 {offsets = [0, 96], sizes = [8, 32], strides = [1, 1]} : vector<8x128xf32> to vector<8x32xf32>
    %328 = math.tanh %327 : vector<8x32xf32>
    %329 = vector.extract_strided_slice %326 {offsets = [0, 0], sizes = [8, 32], strides = [1, 1]} : vector<8x96xf32> to vector<8x32xf32>
    %330 = vector.extract_strided_slice %326 {offsets = [0, 32], sizes = [8, 32], strides = [1, 1]} : vector<8x96xf32> to vector<8x32xf32>
    %331 = vector.extract_strided_slice %326 {offsets = [0, 64], sizes = [8, 32], strides = [1, 1]} : vector<8x96xf32> to vector<8x32xf32>
    %332 = arith.mulf %330, %311 : vector<8x32xf32>
    %333 = arith.mulf %329, %328 : vector<8x32xf32>
    %334 = arith.addf %332, %333 : vector<8x32xf32>
    %335 = math.tanh %334 : vector<8x32xf32>
    %336 = arith.mulf %331, %335 : vector<8x32xf32>
    %c5_i32_90 = arith.constant 5 : i32
    %c8_i32_91 = arith.constant 8 : i32
    %337 = arith.muli %c5_i32_90, %c8_i32_91 : i32
    %338 = tpu.assume_multiple %337, 8 : i32
    %339 = arith.index_cast %338 : i32 to index
    %c0_92 = arith.constant 0 : index
    %340 = vector.load %arg11[%339, %c0_92] : memref<64x128xf32, #tpu.memory_space<vmem>>, vector<8x128xf32>
    %341 = arith.truncf %336 : vector<8x32xf32> to vector<8x32xbf16>
    %cst_93 = arith.constant dense<0.000000e+00> : vector<8x128xf32>
    %342 = tpu.matmul %341, %212, %cst_93 {dimension_numbers = #tpu.dot_dimension_numbers<[1], [0], [0], [1], [0, 0, 1, 1], [], []>} : vector<8x32xbf16>, vector<32x128xbf16>, vector<8x128xf32> -> vector<8x128xf32>
    %343 = arith.addf %340, %342 : vector<8x128xf32>
    %344 = vector.extract_strided_slice %343 {offsets = [0, 0], sizes = [8, 96], strides = [1, 1]} : vector<8x128xf32> to vector<8x96xf32>
    %345 = arith.negf %344 : vector<8x96xf32>
    %346 = math.exp %345 : vector<8x96xf32>
    %cst_94 = arith.constant 1.000000e+00 : f32
    %347 = vector.broadcast %cst_94 : f32 to vector<8x96xf32>
    %348 = arith.addf %347, %346 : vector<8x96xf32>
    %349 = arith.divf %347, %348 : vector<8x96xf32>
    %350 = vector.extract_strided_slice %343 {offsets = [0, 96], sizes = [8, 32], strides = [1, 1]} : vector<8x128xf32> to vector<8x32xf32>
    %351 = math.tanh %350 : vector<8x32xf32>
    %352 = vector.extract_strided_slice %349 {offsets = [0, 0], sizes = [8, 32], strides = [1, 1]} : vector<8x96xf32> to vector<8x32xf32>
    %353 = vector.extract_strided_slice %349 {offsets = [0, 32], sizes = [8, 32], strides = [1, 1]} : vector<8x96xf32> to vector<8x32xf32>
    %354 = vector.extract_strided_slice %349 {offsets = [0, 64], sizes = [8, 32], strides = [1, 1]} : vector<8x96xf32> to vector<8x32xf32>
    %355 = arith.mulf %353, %334 : vector<8x32xf32>
    %356 = arith.mulf %352, %351 : vector<8x32xf32>
    %357 = arith.addf %355, %356 : vector<8x32xf32>
    %358 = math.tanh %357 : vector<8x32xf32>
    %359 = arith.mulf %354, %358 : vector<8x32xf32>
    %c6_i32_95 = arith.constant 6 : i32
    %c8_i32_96 = arith.constant 8 : i32
    %360 = arith.muli %c6_i32_95, %c8_i32_96 : i32
    %361 = tpu.assume_multiple %360, 8 : i32
    %362 = arith.index_cast %361 : i32 to index
    %c0_97 = arith.constant 0 : index
    %363 = vector.load %arg11[%362, %c0_97] : memref<64x128xf32, #tpu.memory_space<vmem>>, vector<8x128xf32>
    %364 = arith.truncf %359 : vector<8x32xf32> to vector<8x32xbf16>
    %cst_98 = arith.constant dense<0.000000e+00> : vector<8x128xf32>
    %365 = tpu.matmul %364, %212, %cst_98 {dimension_numbers = #tpu.dot_dimension_numbers<[1], [0], [0], [1], [0, 0, 1, 1], [], []>} : vector<8x32xbf16>, vector<32x128xbf16>, vector<8x128xf32> -> vector<8x128xf32>
    %366 = arith.addf %363, %365 : vector<8x128xf32>
    %367 = vector.extract_strided_slice %366 {offsets = [0, 0], sizes = [8, 96], strides = [1, 1]} : vector<8x128xf32> to vector<8x96xf32>
    %368 = arith.negf %367 : vector<8x96xf32>
    %369 = math.exp %368 : vector<8x96xf32>
    %cst_99 = arith.constant 1.000000e+00 : f32
    %370 = vector.broadcast %cst_99 : f32 to vector<8x96xf32>
    %371 = arith.addf %370, %369 : vector<8x96xf32>
    %372 = arith.divf %370, %371 : vector<8x96xf32>
    %373 = vector.extract_strided_slice %366 {offsets = [0, 96], sizes = [8, 32], strides = [1, 1]} : vector<8x128xf32> to vector<8x32xf32>
    %374 = math.tanh %373 : vector<8x32xf32>
    %375 = vector.extract_strided_slice %372 {offsets = [0, 0], sizes = [8, 32], strides = [1, 1]} : vector<8x96xf32> to vector<8x32xf32>
    %376 = vector.extract_strided_slice %372 {offsets = [0, 32], sizes = [8, 32], strides = [1, 1]} : vector<8x96xf32> to vector<8x32xf32>
    %377 = vector.extract_strided_slice %372 {offsets = [0, 64], sizes = [8, 32], strides = [1, 1]} : vector<8x96xf32> to vector<8x32xf32>
    %378 = arith.mulf %376, %357 : vector<8x32xf32>
    %379 = arith.mulf %375, %374 : vector<8x32xf32>
    %380 = arith.addf %378, %379 : vector<8x32xf32>
    %381 = math.tanh %380 : vector<8x32xf32>
    %382 = arith.mulf %377, %381 : vector<8x32xf32>
    %c7_i32_100 = arith.constant 7 : i32
    %c8_i32_101 = arith.constant 8 : i32
    %383 = arith.muli %c7_i32_100, %c8_i32_101 : i32
    %384 = tpu.assume_multiple %383, 8 : i32
    %385 = arith.index_cast %384 : i32 to index
    %c0_102 = arith.constant 0 : index
    %386 = vector.load %arg11[%385, %c0_102] : memref<64x128xf32, #tpu.memory_space<vmem>>, vector<8x128xf32>
    %387 = arith.truncf %382 : vector<8x32xf32> to vector<8x32xbf16>
    %cst_103 = arith.constant dense<0.000000e+00> : vector<8x128xf32>
    %388 = tpu.matmul %387, %212, %cst_103 {dimension_numbers = #tpu.dot_dimension_numbers<[1], [0], [0], [1], [0, 0, 1, 1], [], []>} : vector<8x32xbf16>, vector<32x128xbf16>, vector<8x128xf32> -> vector<8x128xf32>
    %389 = arith.addf %386, %388 : vector<8x128xf32>
    %390 = vector.extract_strided_slice %389 {offsets = [0, 0], sizes = [8, 96], strides = [1, 1]} : vector<8x128xf32> to vector<8x96xf32>
    %391 = arith.negf %390 : vector<8x96xf32>
    %392 = math.exp %391 : vector<8x96xf32>
    %cst_104 = arith.constant 1.000000e+00 : f32
    %393 = vector.broadcast %cst_104 : f32 to vector<8x96xf32>
    %394 = arith.addf %393, %392 : vector<8x96xf32>
    %395 = arith.divf %393, %394 : vector<8x96xf32>
    %396 = vector.extract_strided_slice %389 {offsets = [0, 96], sizes = [8, 32], strides = [1, 1]} : vector<8x128xf32> to vector<8x32xf32>
    %397 = math.tanh %396 : vector<8x32xf32>
    %398 = vector.extract_strided_slice %395 {offsets = [0, 0], sizes = [8, 32], strides = [1, 1]} : vector<8x96xf32> to vector<8x32xf32>
    %399 = vector.extract_strided_slice %395 {offsets = [0, 32], sizes = [8, 32], strides = [1, 1]} : vector<8x96xf32> to vector<8x32xf32>
    %400 = vector.extract_strided_slice %395 {offsets = [0, 64], sizes = [8, 32], strides = [1, 1]} : vector<8x96xf32> to vector<8x32xf32>
    %401 = arith.mulf %399, %380 : vector<8x32xf32>
    %402 = arith.mulf %398, %397 : vector<8x32xf32>
    %403 = arith.addf %401, %402 : vector<8x32xf32>
    %404 = math.tanh %403 : vector<8x32xf32>
    %405 = arith.mulf %400, %404 : vector<8x32xf32>
    %c8_i32_105 = arith.constant 8 : i32
    %406 = arith.truncf %405 : vector<8x32xf32> to vector<8x32xbf16>
    %c0_106 = arith.constant 0 : index
    %c0_107 = arith.constant 0 : index
    %407 = vector.load %arg8[%c0_106, %c0_107] : memref<32x128xbf16, #tpu.memory_space<vmem>>, vector<32x128xbf16>
    %cst_108 = arith.constant dense<0.000000e+00> : vector<8x128xf32>
    %408 = tpu.matmul %406, %407, %cst_108 {dimension_numbers = #tpu.dot_dimension_numbers<[1], [0], [0], [1], [0, 0, 1, 1], [], []>} : vector<8x32xbf16>, vector<32x128xbf16>, vector<8x128xf32> -> vector<8x128xf32>
    %c0_109 = arith.constant 0 : index
    %c0_110 = arith.constant 0 : index
    %409 = vector.load %arg9[%c0_109, %c0_110] : memref<1x128xf32, #tpu.memory_space<vmem>>, vector<1x128xf32>
    %410 = vector.broadcast %409 : vector<1x128xf32> to vector<8x128xf32>
    %411 = arith.addf %408, %410 : vector<8x128xf32>
    %412 = arith.negf %411 : vector<8x128xf32>
    %413 = math.exp %412 : vector<8x128xf32>
    %cst_111 = arith.constant 1.000000e+00 : f32
    %414 = vector.broadcast %cst_111 : f32 to vector<8x128xf32>
    %415 = arith.addf %414, %413 : vector<8x128xf32>
    %416 = arith.divf %414, %415 : vector<8x128xf32>
    %c0_112 = arith.constant 0 : index
    %c0_113 = arith.constant 0 : index
    %417 = vector.load %arg10[%c0_112, %c0_113] : memref<8x128xf32, #tpu.memory_space<vmem>>, vector<8x128xf32>
    tpu.vector_store %arg10[%c0_112, %c0_113], %416 {strides = array<i32>} : memref<8x128xf32, #tpu.memory_space<vmem>>, vector<8x128xf32>,
    return
  }
  func.func @transform_0(%arg0: i32) -> (i32, i32, i32) {
    %c0_i32 = arith.constant 0 : i32
    %c0_i32_0 = arith.constant 0 : i32
    %c0_i32_1 = arith.constant 0 : i32
    return %arg0, %c0_i32, %c0_i32_0 : i32, i32, i32
  }
  func.func @transform_1(%arg0: i32) -> (i32, i32) {
    %c0_i32 = arith.constant 0 : i32
    %c0_i32_0 = arith.constant 0 : i32
    %c0_i32_1 = arith.constant 0 : i32
    return %c0_i32, %c0_i32_0 : i32, i32
  }
  func.func @transform_2(%arg0: i32) -> (i32, i32) {
    %c0_i32 = arith.constant 0 : i32
    %c0_i32_0 = arith.constant 0 : i32
    %c0_i32_1 = arith.constant 0 : i32
    return %c0_i32, %c0_i32_0 : i32, i32
  }
  func.func @transform_3(%arg0: i32) -> (i32, i32) {
    %c0_i32 = arith.constant 0 : i32
    %c0_i32_0 = arith.constant 0 : i32
    %c0_i32_1 = arith.constant 0 : i32
    return %c0_i32, %c0_i32_0 : i32, i32
  }
  func.func @transform_4(%arg0: i32) -> (i32, i32) {
    %c0_i32 = arith.constant 0 : i32
    %c0_i32_0 = arith.constant 0 : i32
    %c0_i32_1 = arith.constant 0 : i32
    return %c0_i32, %c0_i32_0 : i32, i32
  }
  func.func @transform_5(%arg0: i32) -> (i32, i32) {
    %c0_i32 = arith.constant 0 : i32
    %c0_i32_0 = arith.constant 0 : i32
    %c0_i32_1 = arith.constant 0 : i32
    return %c0_i32, %c0_i32_0 : i32, i32
  }
  func.func @transform_6(%arg0: i32) -> (i32, i32) {
    %c0_i32 = arith.constant 0 : i32
    %c0_i32_0 = arith.constant 0 : i32
    %c0_i32_1 = arith.constant 0 : i32
    return %c0_i32, %c0_i32_0 : i32, i32
  }
  func.func @transform_7(%arg0: i32) -> (i32, i32) {
    %c0_i32 = arith.constant 0 : i32
    %c0_i32_0 = arith.constant 0 : i32
    %c0_i32_1 = arith.constant 0 : i32
    return %c0_i32, %c0_i32_0 : i32, i32
  }
  func.func @transform_8(%arg0: i32) -> (i32, i32) {
    %c0_i32 = arith.constant 0 : i32
    %c0_i32_0 = arith.constant 0 : i32
    %c0_i32_1 = arith.constant 0 : i32
    return %c0_i32, %c0_i32_0 : i32, i32
  }
  func.func @transform_9(%arg0: i32) -> (i32, i32) {
    %c0_i32 = arith.constant 0 : i32
    %c0_i32_0 = arith.constant 0 : i32
    return %arg0, %c0_i32 : i32, i32
  }
}

</mosaic_0001>

<bundles_post_ra>
// kernel: tpu_custom_call.1
= control target key start
LH: loop header
LB: loop body
LE: loop exit
PB: predicated region body
PF: predicated region fallthrough
CT: control target
= control target key end

     0   :  { %14 = vsyncpa [#allocation5], 0  ;;  %s2549_s0 = inlined_call_operand.vmem [shape: bf16[1,64,16], index: 0, kind: input, shape index: {}]   ;;  %s2550_s1 = inlined_call_operand.hbm [shape: bf16[16,128], index: 1, kind: input, shape index: {}]   ;;  %s2551_s2 = inlined_call_operand.vmem [shape: bf16[32,128], index: 2, kind: input, shape index: {}]   ;;  %s2552_s3 = inlined_call_operand.vmem [shape: f32[1,128], index: 3, kind: input, shape index: {}]   ;;  %s2553_s4 = inlined_call_operand.vmem [shape: bf16[32,128], index: 4, kind: input, shape index: {}]   ;;  %s2554_s5 = inlined_call_operand.vmem [shape: bf16[32,128], index: 5, kind: input, shape index: {}]   ;;  %s2555_s6 = inlined_call_operand.vmem [shape: f32[1,128], index: 6, kind: input, shape index: {}]   ;;  %s2556_s7 = inlined_call_operand.vmem [shape: bf16[32,128], index: 7, kind: input, shape index: {}]   ;;  %s2557_s8 = inlined_call_operand.vmem [shape: f32[1,128], index: 8, kind: input, shape index: {}]   ;;  %s2558_s9 = inlined_call_operand.hbm [shape: f32[8,128], index: 9, kind: output, shape index: {}]  }
   0x1   :  { %15 = vsyncpa [#allocation6], 0  ;;  %s2110_s30 = smov [#allocation4]   ;;  %s2062_s13 = scalar_lea.hbm %s2550_s1, 128 }
   0x2   :  { %s23_s10 = sshll.u32 %s2110_s30, 4  ;;  %p2063_p0 = scmp.ne.s32.totalorder %s2550_s1, %s2062_s13  ;;  %s24_s10 = int_to_ptr.vmem [resolvable:$true] %s23_s10 }
   0x3   :  { %p2066_p1 = scmp.lt.u32.totalorder %s2062_s13, %s2550_s1 }
   0x5   :  { %p2068_p2 = pnand %p2066_p1, %p2063_p0 }
   0x7   :  { %2071 = shalt.err (!%p2068_p2)
}
   0x8   :  { %s2072_s18 = scalar_lea.vmem %s24_s10, 128  ;;  %p2077_p4 = scmp.lt.s32.totalorder %s24_s10, %s24_s10 }
   0x9   :  { %p2073_p3 = scmp.ne.s32.totalorder %s24_s10, %s2072_s18  ;;  %p2078_p5 = scmp.lt.s32.totalorder %s2072_s18, %s2072_s18 }
   0xb   :  { %p2079_p6 = por %p2078_p5, %p2077_p4 }
   0xd   :  { %p2080_p7 = pnand %p2079_p6, %p2073_p3 }
   0xf   :  { %2083 = shalt.err (!%p2080_p7)
}
  0x10   :  { %s2111_s19 = smov 64   ;;  %s2112_s20 = smov 4  }
  0x11   :  { %29 = dma.hbm_to_vmem [thread:$0]  %s2550_s1, 128, %s24_s10, [#allocation5], %s2111_s19, %s2111_s19, %s2112_s20  }
  0x12   :  { %2106 = dma.done.wait [#allocation5], 128  }
  0x13   :  { %2107 = vsyncadd [#allocation5], 4294967168  ;;  %v2113_v0 = vmov 0.0   ;;  %vm2114_vm0 = vmmov 0   ;;  %v1917_v1 = vld [vmem:[#allocation4] sm:$0xff]   ;;  %vm95_vm1 = vcmask 130048  }
  0x14   :  { %1761 = vmatprep.subr.bf16.mxu1 %v2113_v0  ;;  %1765 = vmatprep.mubr.msk.bf16.mxu1 %vm2114_vm0, %v2113_v0  ;;  %v2188_v2 = vld [vmem:[%s2551_s2] sm:$0xff]   ;;  %v1920_v4 = vld [vmem:[%s2549_s0 + $0x8] sm:$0xff]   ;;  %v2115_v6 = vmov 0   ;;  %s2116_s10 = smov 32   ;;  %vm194_vm2 = vcmask 261120   ;;  %v1922_v49 = vld [vmem:[%s2549_s0 + $0x10] sm:$0xff]  }
  0x15   :  { %1751 = vmatprep.subr.bf16.mxu0 %v1917_v1  ;;  %v1919_v3 = vld [vmem:[%s2549_s0] sm:$0xff]   ;;  %1762 = vmatpush3.bf16.msra.mxu1 %v2188_v2  ;;  %v2202_v5 = vld [vmem:[%s2551_s2 + $0x8] sm:$0xff]   ;;  %v1923_v50 = vld [vmem:[%s2549_s0 + $0x18] sm:$0xff]  }
  0x16   :  { %1752 = vmatpush3.bf16.msra.mxu0 %v1917_v1  ;;  %1753 = vmatprep.mubr.msk.bf16.mxu0 %vm95_vm1, %v1919_v3  ;;  %v2222_v7 = vld [vmem:[%s2552_s3] ss:$0 sm:$0xff] }
  0x17   :  { %1763 = vmatprep.subr.bf16.mxu1 %v2113_v0  ;;  %1777 = vmatprep.subr.bf16.mxu0 %v2113_v0 }
  0x19   :  { %1754 = vmatmul.mubr.msk.bf16.vlgmr.msra.gmra.mrb[0].mxu0 %vm95_vm1, %v1920_v4  ;;  %1764 = vmatpush3.bf16.msra.mxu1 %v2202_v5 }
  0x1a   :  { %1778 = vmatpush3.bf16.msra.mxu0 %v2188_v2  ;;  %1769 = vmatprep.subr.bf16.mxu1 %v2113_v0 }
  0x1b   :  { %1779 = vmatprep.subr.bf16.mxu0 %v2113_v0  ;;  %1757 = vmatprep.mubr.msk.bf16.mxu0 %vm95_vm1, %v1922_v49 }
  0x1c   :  { %1766 = vmatmul.mubr.bf16.vlgmr.msra.gmra.mrb[0].mxu1 %v2115_v6 }
  0x1d   :  { %1770 = vmatpush3.bf16.msra.mxu1 %v2188_v2  ;;  %1773 = vmatprep.mubr.msk.bf16.mxu1 %vm2114_vm0, %v2113_v0 }
  0x1e   :  { %1771 = vmatprep.subr.bf16.mxu1 %v2113_v0  ;;  %1780 = vmatpush3.bf16.msra.mxu0 %v2202_v5 }
  0x1f   :  { %1793 = vmatprep.subr.bf16.mxu0 %v2113_v0 }
  0x21   :  { %1772 = vmatpush3.bf16.msra.mxu1 %v2202_v5  ;;  %1758 = vmatmul.mubr.msk.bf16.gmra.mrb[4].mxu0 %vm95_vm1, %v1923_v50 }
  0x22   :  { %1785 = vmatprep.subr.bf16.mxu1 %v2113_v0  ;;  %1781 = vmatprep.mubr.msk.bf16.mxu0 %vm2114_vm0, %v2113_v0 }
  0xec   :  { %v2224_v8 = vpop.f32.mrb[0].mxu0 }
  0xed   :  { %v142_v9 = vpop.f32.mrb[1].mxu0  ;;  %v151_v60 = vadd.f32 %v2224_v8, %v2222_v7 }
  0xee   :  { %v143_v10 = vadd.f32 %v2222_v7, %v142_v9  ;;  %v2227_v11 = vpop.f32.mrb[2].mxu0 }
  0xef   :  { %v145_v12 = vpop.f32.mrb[3].mxu0  ;;  %v232_v13 = vpop.f32.mrb[0].mxu1 }
  0xf0   :  { %v238_v14 = vadd.f32 %v232_v13, %v143_v10  ;;  %v1767_v15 = vpop.f32.mrb[1].mxu1  ;;  %v146_v33 = vadd.f32 %v2222_v7, %v145_v12 }
  0xf1   :  { %v235_v16 = vpop.f32.mrb[2].mxu1 }
  0xf2   :  { %1930 = vtanh.f32 %v238_v14  ;;  %v1768_v17 = vpop.f32.mrb[3].mxu1  ;;  %v1645_v19 = vmul.f32 -1.442695, %v238_v14 }
  0xf4   :  { %1932 = vpow2.f32 %v1645_v19  ;;  %v2263_v55 = vpop.f32.mrb[4].mxu0 }
  0xf5   :  { %v2265_v56 = vpop.f32.mrb[5].mxu0 }
  0xf6   :  { %v2267_v57 = vpop.f32.mrb[6].mxu0 }
  0xf7   :  { %v2269_v58 = vpop.f32.mrb[7].mxu0 }
  0xfc   :  { %v1931_v18 = vpop.eup %1930 }
  0xfd   :  { %248 = vrot.lane.b32.xlu0 %v1931_v18, %s2116_s10 }
  0xfe   :  { %v1933_v20 = vpop.eup %1932 }
  0xff   :  { %v242_v21 = vadd.f32 1.0, %v1933_v20 }
 0x101   :  { %1934 = vrcp.f32 %v242_v21 }
 0x10b   :  { %v1935_v22 = vpop.eup %1934 }
 0x10c   :  { %v246_v25 = vmul.f32 0.0, %v1935_v22 }
 0x16f   :  { %v249_v23 = vpop.permute.xlu0 %248 }
 0x170   :  { %v251_v24 = vmul.f32 %v1935_v22, %v249_v23  ;;  %v154_v23 = vadd.f32 %v2227_v11, %v2222_v7 }
 0x172   :  { %253 = vrot.lane.b32.xlu0 %v251_v24, %s2116_s10 }
 0x1e4   :  { %v254_v26 = vpop.permute.xlu0 %253 }
 0x1e5   :  { %v256_v27 = vadd.f32 %v254_v26, %v246_v25 }
 0x1e7   :  { %1936 = vtanh.f32 %v256_v27 }
 0x1f1   :  { %v1937_v28 = vpop.eup %1936 }
 0x1f2   :  { %259 = vrot.lane.b32.xlu1 %v1937_v28, %s2116_s10 }
 0x264   :  { %v260_v29 = vpop.permute.xlu1 %259 }
 0x265   :  { %v2232_v30 = vmul.f32 %v1935_v22, %v260_v29 }
 0x267   :  { %v270_v31 = vpack.c.bf16 %v2232_v30, %v2232_v30 }
 0x269   :  { %272 = vrot.lane.b32.xlu1 %v270_v31, %s2111_s19 }
 0x2db   :  { %v273_v32 = vpop.permute.xlu1 %272 }
 0x2dc   :  { %1774 = vmatmul.mubr.msk.bf16.vlgmr.msra.gmra.mrb[4].mxu1 %vm194_vm2, %v273_v32 }
 0x2dd   :  { %1786 = vmatpush3.bf16.msra.mxu1 %v2188_v2  ;;  %1789 = vmatprep.mubr.msk.bf16.mxu1 %vm2114_vm0, %v2113_v0 }
 0x2de   :  { %1787 = vmatprep.subr.bf16.mxu1 %v2113_v0 }
 0x2e1   :  { %1788 = vmatpush3.bf16.msra.mxu1 %v2202_v5 }
 0x2e2   :  { %1801 = vmatprep.subr.bf16.mxu1 %v2113_v0 }
 0x3af   :  { %v311_v34 = vpop.f32.mrb[4].mxu1 }
 0x3b0   :  { %v317_v35 = vadd.f32 %v311_v34, %v146_v33  ;;  %v1775_v36 = vpop.f32.mrb[5].mxu1 }
 0x3b1   :  { %v314_v37 = vpop.f32.mrb[6].mxu1 }
 0x3b2   :  { %1938 = vtanh.f32 %v317_v35  ;;  %v1776_v38 = vpop.f32.mrb[7].mxu1  ;;  %v1647_v40 = vmul.f32 -1.442695, %v317_v35 }
 0x3b4   :  { %1940 = vpow2.f32 %v1647_v40 }
 0x3bc   :  { %v1939_v39 = vpop.eup %1938 }
 0x3bd   :  { %327 = vrot.lane.b32.xlu0 %v1939_v39, %s2116_s10 }
 0x3be   :  { %v1941_v41 = vpop.eup %1940 }
 0x3bf   :  { %v321_v42 = vadd.f32 1.0, %v1941_v41 }
 0x3c1   :  { %1942 = vrcp.f32 %v321_v42 }
 0x3cb   :  { %v1943_v43 = vpop.eup %1942 }
 0x3cc   :  { %v325_v46 = vmul.f32 %v1943_v43, %v256_v27 }
 0x42f   :  { %v328_v44 = vpop.permute.xlu0 %327 }
 0x430   :  { %v330_v45 = vmul.f32 %v1943_v43, %v328_v44  ;;  %v159_v44 = vadd.f32 %v2222_v7, %v2265_v56 }
 0x432   :  { %332 = vrot.lane.b32.xlu1 %v330_v45, %s2116_s10 }
 0x4a4   :  { %v333_v47 = vpop.permute.xlu1 %332 }
 0x4a5   :  { %v335_v48 = vadd.f32 %v333_v47, %v325_v46 }
 0x4a7   :  { %1944 = vtanh.f32 %v335_v48 }
 0x4b1   :  { %v1945_v51 = vpop.eup %1944 }
 0x4b2   :  { %338 = vrot.lane.b32.xlu0 %v1945_v51, %s2116_s10 }
 0x524   :  { %v339_v52 = vpop.permute.xlu0 %338 }
 0x525   :  { %v2258_v53 = vmul.f32 %v1943_v43, %v339_v52 }
 0x527   :  { %v350_v54 = vpack.c.bf16 %v2258_v53, %v2258_v53 }
 0x529   :  { %352 = vrot.lane.b32.xlu1 %v350_v54, %s2111_s19 }
 0x59b   :  { %v353_v59 = vpop.permute.xlu1 %352 }
 0x59c   :  { %1782 = vmatmul.mubr.msk.bf16.vlgmr.msra.gmra.mrb[8].mxu0 %vm194_vm2, %v353_v59 }
 0x59d   :  { %1794 = vmatpush3.bf16.msra.mxu0 %v2188_v2  ;;  %1797 = vmatprep.mubr.msk.bf16.mxu0 %vm2114_vm0, %v2113_v0 }
 0x59e   :  { %1795 = vmatprep.subr.bf16.mxu0 %v2113_v0 }
 0x5a1   :  { %1796 = vmatpush3.bf16.msra.mxu0 %v2202_v5 }
 0x5a2   :  { %1809 = vmatprep.subr.bf16.mxu0 %v2113_v0 }
 0x66f   :  { %v391_v61 = vpop.f32.mrb[8].mxu0 }
 0x670   :  { %v397_v62 = vadd.f32 %v391_v61, %v151_v60  ;;  %v1783_v63 = vpop.f32.mrb[9].mxu0 }
 0x671   :  { %v394_v1 = vpop.f32.mrb[10].mxu0 }
 0x672   :  { %1946 = vtanh.f32 %v397_v62  ;;  %v1784_v3 = vpop.f32.mrb[11].mxu0  ;;  %v1649_v9 = vmul.f32 -1.442695, %v397_v62 }
 0x674   :  { %1948 = vpow2.f32 %v1649_v9 }
 0x67c   :  { %v1947_v4 = vpop.eup %1946 }
 0x67d   :  { %407 = vrot.lane.b32.xlu0 %v1947_v4, %s2116_s10 }
 0x67e   :  { %v1949_v10 = vpop.eup %1948 }
 0x67f   :  { %v401_v12 = vadd.f32 1.0, %v1949_v10 }
 0x681   :  { %1950 = vrcp.f32 %v401_v12  ;;  %v162_v12 = vadd.f32 %v2222_v7, %v2269_v58 }
 0x68b   :  { %v1951_v13 = vpop.eup %1950 }
 0x68c   :  { %v405_v8 = vmul.f32 %v1951_v13, %v335_v48 }
 0x6ef   :  { %v408_v14 = vpop.permute.xlu0 %407 }
 0x6f0   :  { %v410_v15 = vmul.f32 %v1951_v13, %v408_v14 }
 0x6f2   :  { %412 = vrot.lane.b32.xlu1 %v410_v15, %s2116_s10 }
 0x764   :  { %v413_v16 = vpop.permute.xlu1 %412 }
 0x765   :  { %v415_v17 = vadd.f32 %v413_v16, %v405_v8 }
 0x767   :  { %1952 = vtanh.f32 %v415_v17 }
 0x771   :  { %v1953_v18 = vpop.eup %1952 }
 0x772   :  { %418 = vrot.lane.b32.xlu0 %v1953_v18, %s2116_s10 }
 0x7e4   :  { %v419_v19 = vpop.permute.xlu0 %418 }
 0x7e5   :  { %v2283_v20 = vmul.f32 %v1951_v13, %v419_v19 }
 0x7e7   :  { %v430_v21 = vpack.c.bf16 %v2283_v20, %v2283_v20 }
 0x7e9   :  { %432 = vrot.lane.b32.xlu1 %v430_v21, %s2111_s19 }
 0x85b   :  { %v433_v22 = vpop.permute.xlu1 %432 }
 0x85c   :  { %1790 = vmatmul.mubr.msk.bf16.vlgmr.msra.gmra.mrb[8].mxu1 %vm194_vm2, %v433_v22 }
 0x85d   :  { %1802 = vmatpush3.bf16.msra.mxu1 %v2188_v2  ;;  %1805 = vmatprep.mubr.msk.bf16.mxu1 %vm2114_vm0, %v2113_v0 }
 0x85e   :  { %1803 = vmatprep.subr.bf16.mxu1 %v2113_v0 }
 0x861   :  { %1804 = vmatpush3.bf16.msra.mxu1 %v2202_v5 }
 0x862   :  { %1817 = vmatprep.subr.bf16.mxu1 %v2113_v0 }
 0x92f   :  { %v471_v24 = vpop.f32.mrb[8].mxu1 }
 0x930   :  { %v477_v25 = vadd.f32 %v471_v24, %v154_v23  ;;  %v1791_v26 = vpop.f32.mrb[9].mxu1 }
 0x931   :  { %v474_v27 = vpop.f32.mrb[10].mxu1 }
 0x932   :  { %1954 = vtanh.f32 %v477_v25  ;;  %v1792_v28 = vpop.f32.mrb[11].mxu1  ;;  %v1651_v31 = vmul.f32 -1.442695, %v477_v25 }
 0x934   :  { %1956 = vpow2.f32 %v1651_v31  ;;  %v167_v31 = vadd.f32 %v2263_v55, %v2222_v7 }
 0x93c   :  { %v1955_v29 = vpop.eup %1954 }
 0x93d   :  { %487 = vrot.lane.b32.xlu0 %v1955_v29, %s2116_s10 }
 0x93e   :  { %v1957_v32 = vpop.eup %1956 }
 0x93f   :  { %v481_v33 = vadd.f32 1.0, %v1957_v32 }
 0x941   :  { %1958 = vrcp.f32 %v481_v33 }
 0x94b   :  { %v1959_v34 = vpop.eup %1958 }
 0x94c   :  { %v485_v11 = vmul.f32 %v1959_v34, %v415_v17 }
 0x9af   :  { %v488_v35 = vpop.permute.xlu0 %487 }
 0x9b0   :  { %v490_v36 = vmul.f32 %v1959_v34, %v488_v35 }
 0x9b2   :  { %492 = vrot.lane.b32.xlu1 %v490_v36, %s2116_s10 }
 0xa24   :  { %v493_v37 = vpop.permute.xlu1 %492 }
 0xa25   :  { %v495_v38 = vadd.f32 %v493_v37, %v485_v11 }
 0xa27   :  { %1960 = vtanh.f32 %v495_v38 }
 0xa31   :  { %v1961_v39 = vpop.eup %1960 }
 0xa32   :  { %498 = vrot.lane.b32.xlu0 %v1961_v39, %s2116_s10 }
 0xaa4   :  { %v499_v40 = vpop.permute.xlu0 %498 }
 0xaa5   :  { %v2300_v41 = vmul.f32 %v1959_v34, %v499_v40 }
 0xaa7   :  { %v510_v42 = vpack.c.bf16 %v2300_v41, %v2300_v41 }
 0xaa9   :  { %512 = vrot.lane.b32.xlu1 %v510_v42, %s2111_s19 }
 0xb1b   :  { %v513_v43 = vpop.permute.xlu1 %512 }
 0xb1c   :  { %1798 = vmatmul.mubr.msk.bf16.vlgmr.msra.gmra.mrb[12].mxu0 %vm194_vm2, %v513_v43 }
 0xb1d   :  { %1810 = vmatpush3.bf16.msra.mxu0 %v2188_v2  ;;  %1813 = vmatprep.mubr.msk.bf16.mxu0 %vm2114_vm0, %v2113_v0 }
 0xb1e   :  { %1811 = vmatprep.subr.bf16.mxu0 %v2113_v0 }
 0xb21   :  { %1812 = vmatpush3.bf16.msra.mxu0 %v2202_v5 }
 0xbef   :  { %v551_v45 = vpop.f32.mrb[12].mxu0 }
 0xbf0   :  { %v557_v46 = vadd.f32 %v551_v45, %v159_v44  ;;  %v1799_v47 = vpop.f32.mrb[13].mxu0 }
 0xbf1   :  { %v554_v48 = vpop.f32.mrb[14].mxu0 }
 0xbf2   :  { %1962 = vtanh.f32 %v557_v46  ;;  %v1800_v49 = vpop.f32.mrb[15].mxu0  ;;  %v1653_v51 = vmul.f32 -1.442695, %v557_v46  ;;  %v1924_v48 = vld [vmem:[%s2553_s4] sm:$0xff]  }
 0xbf3   :  { %1825 = vmatprep.subr.bf16.mxu0 %v1924_v48 }
 0xbf4   :  { %1964 = vpow2.f32 %v1653_v51 }
 0xbfc   :  { %v1963_v50 = vpop.eup %1962 }
 0xbfd   :  { %567 = vrot.lane.b32.xlu0 %v1963_v50, %s2116_s10 }
 0xbfe   :  { %v1965_v52 = vpop.eup %1964 }
 0xbff   :  { %v561_v54 = vadd.f32 1.0, %v1965_v52 }
 0xc01   :  { %1966 = vrcp.f32 %v561_v54 }
 0xc0b   :  { %v1967_v59 = vpop.eup %1966 }
 0xc0c   :  { %v565_v56 = vmul.f32 %v1967_v59, %v495_v38 }
 0xc6f   :  { %v568_v60 = vpop.permute.xlu0 %567 }
 0xc70   :  { %v570_v61 = vmul.f32 %v1967_v59, %v568_v60 }
 0xc72   :  { %572 = vrot.lane.b32.xlu1 %v570_v61, %s2116_s10 }
 0xce4   :  { %v573_v62 = vpop.permute.xlu1 %572 }
 0xce5   :  { %v575_v63 = vadd.f32 %v573_v62, %v565_v56  ;;  %v2375_v62 = vld [vmem:[%s2554_s5] sm:$0xff]  }
 0xce7   :  { %1968 = vtanh.f32 %v575_v63 }
 0xcf1   :  { %v1969_v1 = vpop.eup %1968 }
 0xcf2   :  { %578 = vrot.lane.b32.xlu0 %v1969_v1, %s2116_s10 }
 0xd64   :  { %v579_v3 = vpop.permute.xlu0 %578 }
 0xd65   :  { %v2316_v4 = vmul.f32 %v1967_v59, %v579_v3 }
 0xd67   :  { %v590_v9 = vpack.c.bf16 %v2316_v4, %v2316_v4 }
 0xd69   :  { %592 = vrot.lane.b32.xlu1 %v590_v9, %s2111_s19 }
 0xddb   :  { %v593_v10 = vpop.permute.xlu1 %592 }
 0xddc   :  { %1806 = vmatmul.mubr.msk.bf16.vlgmr.msra.gmra.mrb[12].mxu1 %vm194_vm2, %v593_v10 }
 0xddd   :  { %1818 = vmatpush3.bf16.msra.mxu1 %v2188_v2  ;;  %1821 = vmatprep.mubr.msk.bf16.mxu1 %vm2114_vm0, %v2113_v0 }
 0xdde   :  { %1819 = vmatprep.subr.bf16.mxu1 %v2113_v0 }
 0xde1   :  { %1820 = vmatpush3.bf16.msra.mxu1 %v2202_v5 }
 0xde2   :  { %1837 = vmatprep.subr.bf16.mxu1 %v2113_v0 }
 0xeaf   :  { %v631_v13 = vpop.f32.mrb[12].mxu1 }
 0xeb0   :  { %v637_v14 = vadd.f32 %v631_v13, %v162_v12  ;;  %v1807_v15 = vpop.f32.mrb[13].mxu1 }
 0xeb1   :  { %v634_v8 = vpop.f32.mrb[14].mxu1 }
 0xeb2   :  { %1970 = vtanh.f32 %v637_v14  ;;  %v1808_v16 = vpop.f32.mrb[15].mxu1  ;;  %v1655_v2 = vmul.f32 -1.442695, %v637_v14 }
 0xeb4   :  { %1972 = vpow2.f32 %v1655_v2 }
 0xebc   :  { %v1971_v17 = vpop.eup %1970 }
 0xebd   :  { %647 = vrot.lane.b32.xlu0 %v1971_v17, %s2116_s10  ;;  %v2412_v17 = vld [vmem:[%s2555_s6] ss:$0 sm:$0xff] }
 0xebe   :  { %v1973_v18 = vpop.eup %1972 }
 0xebf   :  { %v641_v19 = vadd.f32 1.0, %v1973_v18 }
 0xec1   :  { %1974 = vrcp.f32 %v641_v19 }
 0xecb   :  { %v1975_v5 = vpop.eup %1974 }
 0xecc   :  { %v645_v58 = vmul.f32 %v1975_v5, %v575_v63  ;;  %v2383_v63 = vld [vmem:[%s2554_s5 + $0x8] sm:$0xff]  }
 0xf2f   :  { %v648_v21 = vpop.permute.xlu0 %647 }
 0xf30   :  { %v650_v22 = vmul.f32 %v1975_v5, %v648_v21 }
 0xf32   :  { %652 = vrot.lane.b32.xlu1 %v650_v22, %s2116_s10 }
 0xfa4   :  { %v653_v23 = vpop.permute.xlu1 %652 }
 0xfa5   :  { %v655_v24 = vadd.f32 %v653_v23, %v645_v58 }
 0xfa7   :  { %1976 = vtanh.f32 %v655_v24 }
 0xfb1   :  { %v1977_v25 = vpop.eup %1976 }
 0xfb2   :  { %658 = vrot.lane.b32.xlu0 %v1977_v25, %s2116_s10 }
0x1024   :  { %v659_v26 = vpop.permute.xlu0 %658 }
0x1025   :  { %v2333_v27 = vmul.f32 %v1975_v5, %v659_v26 }
0x1027   :  { %v670_v28 = vpack.c.bf16 %v2333_v27, %v2333_v27 }
0x1029   :  { %672 = vrot.lane.b32.xlu1 %v670_v28, %s2111_s19 }
0x109b   :  { %v673_v29 = vpop.permute.xlu1 %672 }
0x109c   :  { %1814 = vmatmul.mubr.msk.bf16.vlgmr.msra.gmra.mrb[16].mxu0 %vm194_vm2, %v673_v29 }
0x109d   :  { %1826 = vmatpush3.bf16.msra.mxu0 %v1924_v48 }
0x116f   :  { %v711_v32 = vpop.f32.mrb[16].mxu0 }
0x1170   :  { %v717_v33 = vadd.f32 %v711_v32, %v167_v31  ;;  %v1815_v34 = vpop.f32.mrb[17].mxu0 }
0x1171   :  { %v714_v35 = vpop.f32.mrb[18].mxu0 }
0x1172   :  { %1978 = vtanh.f32 %v717_v33  ;;  %v1816_v36 = vpop.f32.mrb[19].mxu0  ;;  %v1657_v37 = vmul.f32 -1.442695, %v717_v33 }
0x1174   :  { %1980 = vpow2.f32 %v1657_v37 }
0x117c   :  { %v1979_v11 = vpop.eup %1978 }
0x117d   :  { %727 = vrot.lane.b32.xlu0 %v1979_v11, %s2116_s10 }
0x117e   :  { %v1981_v38 = vpop.eup %1980 }
0x117f   :  { %v721_v39 = vadd.f32 1.0, %v1981_v38 }
0x1181   :  { %1982 = vrcp.f32 %v721_v39 }
0x118b   :  { %v1983_v40 = vpop.eup %1982 }
0x118c   :  { %v725_v55 = vmul.f32 %v1983_v40, %v655_v24 }
0x11ef   :  { %v728_v42 = vpop.permute.xlu0 %727 }
0x11f0   :  { %v730_v43 = vmul.f32 %v1983_v40, %v728_v42 }
0x11f2   :  { %732 = vrot.lane.b32.xlu1 %v730_v43, %s2116_s10 }
0x11f6   :  { %264 = vrot.lane.b32.xlu1 %v2232_v30, %s2111_s19  ;;  %v1925_v30 = vld [vmem:[%s2553_s4 + $0x8] sm:$0xff]  }
0x11f7   :  { %1827 = vmatprep.subr.bf16.mxu0 %v1925_v30 }
0x11f8   :  { %1828 = vmatpush3.bf16.msra.mxu0 %v1925_v30 }
0x11f9   :  { %1853 = vmatprep.subr.bf16.mxu0 %v2113_v0 }
0x11fa   :  { %423 = vrot.lane.b32.xlu1 %v2283_v20, %s2111_s19 }
0x1264   :  { %v733_v44 = vpop.permute.xlu1 %732 }
0x1265   :  { %v2347_v45 = vadd.f32 %v733_v44, %v725_v55 }
0x1267   :  { %1984 = vtanh.f32 %v2347_v45 }
0x1268   :  { %v265_v46 = vpop.permute.xlu1 %264 }
0x1269   :  { %267 = vst.msk [vmem:[#allocation3] sm:$0xff] %vm194_vm2, %v265_v46 }
0x126c   :  { %v424_v47 = vpop.permute.xlu1 %423 }
0x126d   :  { %427 = vst.msk [vmem:[#allocation3 + $0x10] sm:$0xff] %vm194_vm2, %v424_v47 }
0x1270   :  { %v837_v59 = vld [vmem:[#allocation3] sm:$0xff] }
0x1271   :  { %v1985_v20 = vpop.eup %1984 }
0x1272   :  { %738 = vrot.lane.b32.xlu0 %v1985_v20, %s2116_s10 }
0x1276   :  { %343 = vrot.lane.b32.xlu0 %v2258_v53, %s2111_s19 }
0x127a   :  { %503 = vrot.lane.b32.xlu0 %v2300_v41, %s2111_s19  ;;  %v839_v41 = vld [vmem:[#allocation3 + $0x10] sm:$0xff] }
0x12e4   :  { %v739_v49 = vpop.permute.xlu0 %738 }
0x12e5   :  { %v2364_v50 = vmul.f32 %v1983_v40, %v739_v49 }
0x12e7   :  { %v750_v51 = vpack.c.bf16 %v2364_v50, %v2364_v50 }
0x12e8   :  { %v344_v52 = vpop.permute.xlu0 %343 }
0x12e9   :  { %347 = vst.msk [vmem:[#allocation3 + $0x8] sm:$0xff] %vm194_vm2, %v344_v52  ;;  %752 = vrot.lane.b32.xlu1 %v750_v51, %s2111_s19 }
0x12ec   :  { %v504_v54 = vpop.permute.xlu0 %503 }
0x12ed   :  { %507 = vst.msk [vmem:[#allocation3 + $0x18] sm:$0xff] %vm194_vm2, %v504_v54 }
0x12f0   :  { %v838_v60 = vld [vmem:[#allocation3 + $0x8] sm:$0xff] }
0x12f1   :  { %v845_v53 = vpack.c.bf16 %v838_v60, %v837_v59 }
0x12f3   :  { %1829 = vmatprep.mubr.msk.bf16.mxu0 %vm194_vm2, %v845_v53 }
0x12f4   :  { %v840_v61 = vld [vmem:[#allocation3 + $0x18] sm:$0xff] }
0x12f5   :  { %v846_v56 = vpack.c.bf16 %v840_v61, %v839_v41 }
0x12f7   :  { %1830 = vmatmul.mubr.msk.bf16.vlgmr.msra.gmra.mrb[20].mxu0 %vm194_vm2, %v846_v56 }
0x12f8   :  { %1854 = vmatpush3.bf16.msra.mxu0 %v2375_v62 }
0x12f9   :  { %1855 = vmatprep.subr.bf16.mxu0 %v2113_v0 }
0x12fc   :  { %1856 = vmatpush3.bf16.msra.mxu0 %v2383_v63 }
0x12fd   :  { %1869 = vmatprep.subr.bf16.mxu0 %v2113_v0 }
0x135b   :  { %v753_v1 = vpop.permute.xlu1 %752 }
0x135c   :  { %1822 = vmatmul.mubr.msk.bf16.vlgmr.msra.gmra.mrb[16].mxu1 %vm194_vm2, %v753_v1 }
0x135d   :  { %1838 = vmatpush3.bf16.msra.mxu1 %v2375_v62  ;;  %1841 = vmatprep.mubr.msk.bf16.mxu1 %vm2114_vm0, %v2113_v0 }
0x135e   :  { %1839 = vmatprep.subr.bf16.mxu1 %v2113_v0 }
0x1361   :  { %1840 = vmatpush3.bf16.msra.mxu1 %v2383_v63 }
0x1362   :  { %1845 = vmatprep.subr.bf16.mxu1 %v2113_v0 }
0x1364   :  { %1842 = vmatmul.mubr.bf16.vlgmr.msra.gmra.mrb[20].mxu1 %v2115_v6  ;;  %v170_v6 = vadd.f32 %v2267_v57, %v2222_v7 }
0x1365   :  { %1846 = vmatpush3.bf16.msra.mxu1 %v2375_v62  ;;  %1849 = vmatprep.mubr.msk.bf16.mxu1 %vm2114_vm0, %v2113_v0 }
0x1366   :  { %1847 = vmatprep.subr.bf16.mxu1 %v2113_v0 }
0x1369   :  { %1848 = vmatpush3.bf16.msra.mxu1 %v2383_v63 }
0x136a   :  { %1861 = vmatprep.subr.bf16.mxu1 %v2113_v0 }
0x13ca   :  { %v2401_v3 = vpop.f32.mrb[20].mxu0 }
0x13cb   :  { %v913_v9 = vpop.f32.mrb[21].mxu0 }
0x13cc   :  { %v2403_v10 = vpop.f32.mrb[22].mxu0  ;;  %v914_v2 = vadd.f32 %v2412_v17, %v913_v9 }
0x13cd   :  { %v2405_v12 = vpop.f32.mrb[23].mxu0 }
0x13ce   :  { %v917_v20 = vadd.f32 %v2412_v17, %v2405_v12 }
0x142f   :  { %v791_v13 = vpop.f32.mrb[16].mxu1 }
0x1430   :  { %v797_v14 = vadd.f32 %v791_v13, %v170_v6  ;;  %v1823_v15 = vpop.f32.mrb[17].mxu1 }
0x1431   :  { %v794_v8 = vpop.f32.mrb[18].mxu1 }
0x1432   :  { %v1824_v16 = vpop.f32.mrb[19].mxu1  ;;  %v1659_v34 = vmul.f32 -1.442695, %v797_v14 }
0x1437   :  { %v999_v18 = vpop.f32.mrb[20].mxu1 }
0x1438   :  { %v1005_v19 = vadd.f32 %v999_v18, %v914_v2  ;;  %v1843_v5 = vpop.f32.mrb[21].mxu1 }
0x1439   :  { %v1002_v21 = vpop.f32.mrb[22].mxu1 }
0x143a   :  { %1986 = vtanh.f32 %v1005_v19  ;;  %v1844_v22 = vpop.f32.mrb[23].mxu1  ;;  %v1669_v7 = vmul.f32 -1.442695, %v1005_v19 }
0x143c   :  { %1988 = vpow2.f32 %v1669_v7 }
0x1444   :  { %v1987_v58 = vpop.eup %1986 }
0x1445   :  { %1015 = vrot.lane.b32.xlu0 %v1987_v58, %s2116_s10 }
0x1446   :  { %v1989_v57 = vpop.eup %1988 }
0x1447   :  { %v1009_v23 = vadd.f32 1.0, %v1989_v57 }
0x1449   :  { %1990 = vrcp.f32 %v1009_v23 }
0x1453   :  { %v1991_v24 = vpop.eup %1990 }
0x1454   :  { %v1013_v28 = vmul.f32 0.0, %v1991_v24 }
0x14b7   :  { %v1016_v25 = vpop.permute.xlu0 %1015 }
0x14b8   :  { %v1018_v26 = vmul.f32 %v1991_v24, %v1016_v25  ;;  %v922_v25 = vadd.f32 %v2401_v3, %v2412_v17 }
0x14ba   :  { %1020 = vrot.lane.b32.xlu1 %v1018_v26, %s2116_s10 }
0x152c   :  { %v1021_v29 = vpop.permute.xlu1 %1020 }
0x152d   :  { %v1023_v31 = vadd.f32 %v1021_v29, %v1013_v28 }
0x152f   :  { %1992 = vtanh.f32 %v1023_v31 }
0x1530   :  { %1994 = vtanh.f32 %v797_v14 }
0x1531   :  { %1996 = vpow2.f32 %v1659_v34 }
0x1539   :  { %v1993_v32 = vpop.eup %1992 }
0x153a   :  { %1026 = vrot.lane.b32.xlu0 %v1993_v32, %s2116_s10  ;;  %v1995_v33 = vpop.eup %1994 }
0x153b   :  { %v1997_v35 = vpop.eup %1996 }
0x153c   :  { %v801_v36 = vadd.f32 1.0, %v1997_v35 }
0x153e   :  { %807 = vrot.lane.b32.xlu0 %v1995_v33, %s2116_s10  ;;  %1998 = vrcp.f32 %v801_v36 }
0x1548   :  { %v1999_v39 = vpop.eup %1998 }
0x1549   :  { %v805_v55 = vmul.f32 %v1999_v39, %v2347_v45 }
0x15ac   :  { %v1027_v11 = vpop.permute.xlu0 %1026 }
0x15ad   :  { %v1029_v37 = vmul.f32 %v1991_v24, %v1027_v11 }
0x15af   :  { %v1031_v38 = vpack.c.bf16 %v1029_v37, %v1029_v37 }
0x15b0   :  { %v808_v40 = vpop.permute.xlu0 %807 }
0x15b1   :  { %v810_v42 = vmul.f32 %v1999_v39, %v808_v40  ;;  %1033 = vrot.lane.b32.xlu1 %v1031_v38, %s2111_s19 }
0x15b3   :  { %812 = vrot.lane.b32.xlu0 %v810_v42, %s2116_s10 }
0x1623   :  { %v1034_v43 = vpop.permute.xlu1 %1033 }
0x1624   :  { %1850 = vmatmul.mubr.msk.bf16.vlgmr.msra.gmra.mrb[24].mxu1 %vm194_vm2, %v1034_v43 }
0x1625   :  { %v813_v44 = vpop.permute.xlu0 %812  ;;  %1862 = vmatpush3.bf16.msra.mxu1 %v2375_v62  ;;  %1865 = vmatprep.mubr.msk.bf16.mxu1 %vm2114_vm0, %v2113_v0 }
0x1626   :  { %v815_v46 = vadd.f32 %v813_v44, %v805_v55  ;;  %1863 = vmatprep.subr.bf16.mxu1 %v2113_v0 }
0x1628   :  { %2000 = vtanh.f32 %v815_v46 }
0x1629   :  { %1864 = vmatpush3.bf16.msra.mxu1 %v2383_v63 }
0x162a   :  { %1877 = vmatprep.subr.bf16.mxu1 %v2113_v0 }
0x1632   :  { %v2001_v47 = vpop.eup %2000 }
0x1633   :  { %818 = vrot.lane.b32.xlu0 %v2001_v47, %s2116_s10  ;;  %v925_v47 = vadd.f32 %v2403_v10, %v2412_v17 }
0x1637   :  { %583 = vrot.lane.b32.xlu0 %v2316_v4, %s2111_s19 }
0x163b   :  { %743 = vrot.lane.b32.xlu0 %v2364_v50, %s2111_s19 }
0x16a5   :  { %v819_v45 = vpop.permute.xlu0 %818 }
0x16a6   :  { %v821_v13 = vmul.f32 %v1999_v39, %v819_v45 }
0x16a9   :  { %v584_v48 = vpop.permute.xlu0 %583 }
0x16aa   :  { %587 = vst.msk [vmem:[#allocation3 + $0x20] sm:$0xff] %vm194_vm2, %v584_v48 }
0x16ad   :  { %v744_v30 = vpop.permute.xlu0 %743 }
0x16ae   :  { %747 = vst.msk [vmem:[#allocation3 + $0x30] sm:$0xff] %vm194_vm2, %v744_v30 }
0x16b1   :  { %v841_v18 = vld [vmem:[#allocation3 + $0x20] sm:$0xff] }
0x16f7   :  { %v1072_v49 = vpop.f32.mrb[24].mxu1 }
0x16f8   :  { %v1078_v51 = vadd.f32 %v1072_v49, %v917_v20  ;;  %v1851_v52 = vpop.f32.mrb[25].mxu1 }
0x16f9   :  { %v1075_v54 = vpop.f32.mrb[26].mxu1 }
0x16fa   :  { %2002 = vtanh.f32 %v1078_v51  ;;  %v1852_v59 = vpop.f32.mrb[27].mxu1  ;;  %v1671_v50 = vmul.f32 -1.442695, %v1078_v51 }
0x16fc   :  { %2004 = vpow2.f32 %v1671_v50 }
0x1704   :  { %v2003_v4 = vpop.eup %2002 }
0x1705   :  { %1088 = vrot.lane.b32.xlu1 %v2003_v4, %s2116_s10 }
0x1706   :  { %v2005_v60 = vpop.eup %2004 }
0x1707   :  { %v1082_v53 = vadd.f32 1.0, %v2005_v60 }
0x1709   :  { %2006 = vrcp.f32 %v1082_v53 }
0x1713   :  { %v2007_v41 = vpop.eup %2006 }
0x1714   :  { %v1086_v1 = vmul.f32 %v2007_v41, %v1023_v31 }
0x1777   :  { %v1089_v61 = vpop.permute.xlu1 %1088 }
0x1778   :  { %v1091_v56 = vmul.f32 %v2007_v41, %v1089_v61 }
0x177a   :  { %1093 = vrot.lane.b32.xlu1 %v1091_v56, %s2116_s10 }
0x17ec   :  { %v1094_v9 = vpop.permute.xlu1 %1093 }
0x17ed   :  { %v1096_v12 = vadd.f32 %v1094_v9, %v1086_v1 }
0x17ef   :  { %2008 = vtanh.f32 %v1096_v12 }
0x17f9   :  { %v2009_v6 = vpop.eup %2008 }
0x17fa   :  { %1099 = vrot.lane.b32.xlu1 %v2009_v6, %s2116_s10 }
0x17fe   :  { %663 = vrot.lane.b32.xlu1 %v2333_v27, %s2111_s19  ;;  %v843_v27 = vld [vmem:[#allocation3 + $0x30] sm:$0xff] }
0x1802   :  { %823 = vrot.lane.b32.xlu1 %v821_v13, %s2111_s19 }
0x186c   :  { %v1100_v14 = vpop.permute.xlu1 %1099 }
0x186d   :  { %v1102_v15 = vmul.f32 %v2007_v41, %v1100_v14 }
0x186f   :  { %v1104_v8 = vpack.c.bf16 %v1102_v15, %v1102_v15 }
0x1870   :  { %v664_v16 = vpop.permute.xlu1 %663 }
0x1871   :  { %667 = vst.msk [vmem:[#allocation3 + $0x28] sm:$0xff] %vm194_vm2, %v664_v16  ;;  %1106 = vrot.lane.b32.xlu0 %v1104_v8, %s2111_s19 }
0x1874   :  { %v824_v2 = vpop.permute.xlu1 %823 }
0x1875   :  { %827 = vst.msk [vmem:[#allocation3 + $0x38] sm:$0xff] %vm194_vm2, %v824_v2 }
0x1878   :  { %v842_v19 = vld [vmem:[#allocation3 + $0x28] sm:$0xff] }
0x1879   :  { %v847_v5 = vpack.c.bf16 %v842_v19, %v841_v18 }
0x187b   :  { %1833 = vmatprep.mubr.msk.bf16.mxu0 %vm194_vm2, %v847_v5 }
0x187c   :  { %v844_v21 = vld [vmem:[#allocation3 + $0x38] sm:$0xff] }
0x187d   :  { %v848_v22 = vpack.c.bf16 %v844_v21, %v843_v27 }
0x187f   :  { %1834 = vmatmul.mubr.msk.bf16.gmra.mrb[24].mxu0 %vm194_vm2, %v848_v22 }
0x1880   :  { %1857 = vmatprep.mubr.msk.bf16.mxu0 %vm2114_vm0, %v2113_v0 }
0x18e3   :  { %v1107_v58 = vpop.permute.xlu0 %1106 }
0x18e4   :  { %1858 = vmatmul.mubr.msk.bf16.vlgmr.msra.gmra.mrb[28].mxu0 %vm194_vm2, %v1107_v58 }
0x18e5   :  { %1870 = vmatpush3.bf16.msra.mxu0 %v2375_v62  ;;  %1873 = vmatprep.mubr.msk.bf16.mxu0 %vm2114_vm0, %v2113_v0 }
0x18e6   :  { %1871 = vmatprep.subr.bf16.mxu0 %v2113_v0 }
0x18e9   :  { %1872 = vmatpush3.bf16.msra.mxu0 %v2383_v63 }
0x18ea   :  { %1885 = vmatprep.subr.bf16.mxu0 %v2113_v0 }
0x1952   :  { %v2458_v7 = vpop.f32.mrb[24].mxu0 }
0x1953   :  { %v2460_v57 = vpop.f32.mrb[25].mxu0 }
0x1954   :  { %v2462_v23 = vpop.f32.mrb[26].mxu0  ;;  %v930_v6 = vadd.f32 %v2412_v17, %v2460_v57 }
0x1955   :  { %v2464_v24 = vpop.f32.mrb[27].mxu0 }
0x19b7   :  { %v1145_v26 = vpop.f32.mrb[28].mxu0 }
0x19b8   :  { %v1151_v28 = vadd.f32 %v1145_v26, %v922_v25  ;;  %v1859_v29 = vpop.f32.mrb[29].mxu0 }
0x19b9   :  { %v1148_v31 = vpop.f32.mrb[30].mxu0 }
0x19ba   :  { %2010 = vtanh.f32 %v1151_v28  ;;  %v1860_v32 = vpop.f32.mrb[31].mxu0  ;;  %v1673_v34 = vmul.f32 -1.442695, %v1151_v28 }
0x19bc   :  { %2012 = vpow2.f32 %v1673_v34 }
0x19c4   :  { %v2011_v33 = vpop.eup %2010 }
0x19c5   :  { %1161 = vrot.lane.b32.xlu1 %v2011_v33, %s2116_s10  ;;  %v933_v33 = vadd.f32 %v2412_v17, %v2464_v24 }
0x19c6   :  { %v2013_v35 = vpop.eup %2012 }
0x19c7   :  { %v1155_v36 = vadd.f32 1.0, %v2013_v35 }
0x19c9   :  { %2014 = vrcp.f32 %v1155_v36 }
0x19d3   :  { %v2015_v11 = vpop.eup %2014 }
0x19d4   :  { %v1159_v3 = vmul.f32 %v2015_v11, %v1096_v12 }
0x1a37   :  { %v1162_v37 = vpop.permute.xlu1 %1161 }
0x1a38   :  { %v1164_v38 = vmul.f32 %v2015_v11, %v1162_v37 }
0x1a3a   :  { %1166 = vrot.lane.b32.xlu0 %v1164_v38, %s2116_s10 }
0x1aac   :  { %v1167_v39 = vpop.permute.xlu0 %1166 }
0x1aad   :  { %v1169_v40 = vadd.f32 %v1167_v39, %v1159_v3 }
0x1aaf   :  { %2016 = vtanh.f32 %v1169_v40 }
0x1ab9   :  { %v2017_v42 = vpop.eup %2016 }
0x1aba   :  { %1172 = vrot.lane.b32.xlu1 %v2017_v42, %s2116_s10 }
0x1b2c   :  { %v1173_v43 = vpop.permute.xlu1 %1172 }
0x1b2d   :  { %v1175_v55 = vmul.f32 %v2015_v11, %v1173_v43 }
0x1b2f   :  { %v1177_v44 = vpack.c.bf16 %v1175_v55, %v1175_v55 }
0x1b31   :  { %1179 = vrot.lane.b32.xlu0 %v1177_v44, %s2111_s19 }
0x1ba3   :  { %v1180_v46 = vpop.permute.xlu0 %1179 }
0x1ba4   :  { %1866 = vmatmul.mubr.msk.bf16.vlgmr.msra.gmra.mrb[28].mxu1 %vm194_vm2, %v1180_v46 }
0x1ba5   :  { %1878 = vmatpush3.bf16.msra.mxu1 %v2375_v62  ;;  %1881 = vmatprep.mubr.msk.bf16.mxu1 %vm2114_vm0, %v2113_v0 }
0x1ba6   :  { %1879 = vmatprep.subr.bf16.mxu1 %v2113_v0 }
0x1ba9   :  { %1880 = vmatpush3.bf16.msra.mxu1 %v2383_v63 }
0x1baa   :  { %1893 = vmatprep.subr.bf16.mxu1 %v2113_v0 }
0x1c77   :  { %v1218_v45 = vpop.f32.mrb[28].mxu1 }
0x1c78   :  { %v1224_v48 = vadd.f32 %v1218_v45, %v925_v47  ;;  %v1867_v30 = vpop.f32.mrb[29].mxu1 }
0x1c79   :  { %v1221_v20 = vpop.f32.mrb[30].mxu1  ;;  %v938_v30 = vadd.f32 %v2458_v7, %v2412_v17 }
0x1c7a   :  { %2018 = vtanh.f32 %v1224_v48  ;;  %v1868_v49 = vpop.f32.mrb[31].mxu1  ;;  %v1675_v52 = vmul.f32 -1.442695, %v1224_v48 }
0x1c7c   :  { %2020 = vpow2.f32 %v1675_v52 }
0x1c84   :  { %v2019_v51 = vpop.eup %2018 }
0x1c85   :  { %1234 = vrot.lane.b32.xlu1 %v2019_v51, %s2116_s10 }
0x1c86   :  { %v2021_v54 = vpop.eup %2020 }
0x1c87   :  { %v1228_v59 = vadd.f32 1.0, %v2021_v54 }
0x1c89   :  { %2022 = vrcp.f32 %v1228_v59 }
0x1c93   :  { %v2023_v4 = vpop.eup %2022 }
0x1c94   :  { %v1232_v10 = vmul.f32 %v2023_v4, %v1169_v40 }
0x1cf7   :  { %v1235_v50 = vpop.permute.xlu1 %1234 }
0x1cf8   :  { %v1237_v60 = vmul.f32 %v2023_v4, %v1235_v50 }
0x1cfa   :  { %1239 = vrot.lane.b32.xlu0 %v1237_v60, %s2116_s10 }
0x1d6c   :  { %v1240_v53 = vpop.permute.xlu0 %1239 }
0x1d6d   :  { %v1242_v41 = vadd.f32 %v1240_v53, %v1232_v10 }
0x1d6f   :  { %2024 = vtanh.f32 %v1242_v41 }
0x1d79   :  { %v2025_v61 = vpop.eup %2024 }
0x1d7a   :  { %1245 = vrot.lane.b32.xlu1 %v2025_v61, %s2116_s10 }
0x1dec   :  { %v1246_v56 = vpop.permute.xlu1 %1245 }
0x1ded   :  { %v1248_v1 = vmul.f32 %v2023_v4, %v1246_v56 }
0x1def   :  { %v1250_v9 = vpack.c.bf16 %v1248_v1, %v1248_v1 }
0x1df1   :  { %1252 = vrot.lane.b32.xlu0 %v1250_v9, %s2111_s19 }
0x1e63   :  { %v1253_v12 = vpop.permute.xlu0 %1252 }
0x1e64   :  { %1874 = vmatmul.mubr.msk.bf16.vlgmr.msra.gmra.mrb[32].mxu0 %vm194_vm2, %v1253_v12 }
0x1e65   :  { %1886 = vmatpush3.bf16.msra.mxu0 %v2375_v62  ;;  %1889 = vmatprep.mubr.msk.bf16.mxu0 %vm2114_vm0, %v2113_v0 }
0x1e66   :  { %1887 = vmatprep.subr.bf16.mxu0 %v2113_v0 }
0x1e69   :  { %1888 = vmatpush3.bf16.msra.mxu0 %v2383_v63 }
0x1e6a   :  { %1901 = vmatprep.subr.bf16.mxu0 %v2113_v0 }
0x1f37   :  { %v1291_v13 = vpop.f32.mrb[32].mxu0 }
0x1f38   :  { %v1297_v14 = vadd.f32 %v1291_v13, %v930_v6  ;;  %v1875_v15 = vpop.f32.mrb[33].mxu0 }
0x1f39   :  { %v1294_v8 = vpop.f32.mrb[34].mxu0 }
0x1f3a   :  { %2026 = vtanh.f32 %v1297_v14  ;;  %v1876_v16 = vpop.f32.mrb[35].mxu0  ;;  %v1677_v18 = vmul.f32 -1.442695, %v1297_v14  ;;  %v941_v14 = vadd.f32 %v2462_v23, %v2412_v17 }
0x1f3c   :  { %2028 = vpow2.f32 %v1677_v18 }
0x1f44   :  { %v2027_v2 = vpop.eup %2026 }
0x1f45   :  { %1307 = vrot.lane.b32.xlu1 %v2027_v2, %s2116_s10 }
0x1f46   :  { %v2029_v19 = vpop.eup %2028 }
0x1f47   :  { %v1301_v5 = vadd.f32 1.0, %v2029_v19 }
0x1f49   :  { %2030 = vrcp.f32 %v1301_v5 }
0x1f53   :  { %v2031_v27 = vpop.eup %2030 }
0x1f54   :  { %v1305_v58 = vmul.f32 %v2031_v27, %v1242_v41 }
0x1fb7   :  { %v1308_v21 = vpop.permute.xlu1 %1307 }
0x1fb8   :  { %v1310_v22 = vmul.f32 %v2031_v27, %v1308_v21 }
0x1fba   :  { %1312 = vrot.lane.b32.xlu0 %v1310_v22, %s2116_s10 }
0x202c   :  { %v1313_v57 = vpop.permute.xlu0 %1312 }
0x202d   :  { %v1315_v25 = vadd.f32 %v1313_v57, %v1305_v58 }
0x202f   :  { %2032 = vtanh.f32 %v1315_v25 }
0x2039   :  { %v2033_v26 = vpop.eup %2032 }
0x203a   :  { %1318 = vrot.lane.b32.xlu1 %v2033_v26, %s2116_s10  ;;  %v1928_v26 = vld [vmem:[%s2556_s7] sm:$0xff]  }
0x20ac   :  { %v1319_v28 = vpop.permute.xlu1 %1318 }
0x20ad   :  { %v1321_v29 = vmul.f32 %v2031_v27, %v1319_v28  ;;  %v1929_v28 = vld [vmem:[%s2556_s7 + $0x8] sm:$0xff]   ;;  %s2117_s7 = smov [#allocation7]  }
0x20ae   :  { %s1624_s1 = sshll.u32 %s2117_s7, 4  ;;  %s1625_s1 = int_to_ptr.vmem [resolvable:$true] %s1624_s1 }
0x20af   :  { %v1323_v31 = vpack.c.bf16 %v1321_v29, %v1321_v29  ;;  %p2089_p9 = scmp.lt.s32.totalorder %s1625_s1, %s1625_s1 }
0x20b1   :  { %1325 = vrot.lane.b32.xlu0 %v1323_v31, %s2111_s19 }
0x2123   :  { %v1326_v32 = vpop.permute.xlu0 %1325 }
0x2124   :  { %1882 = vmatmul.mubr.msk.bf16.vlgmr.msra.gmra.mrb[32].mxu1 %vm194_vm2, %v1326_v32 }
0x2125   :  { %1894 = vmatpush3.bf16.msra.mxu1 %v2375_v62  ;;  %1897 = vmatprep.mubr.msk.bf16.mxu1 %vm2114_vm0, %v2113_v0 }
0x2126   :  { %1895 = vmatprep.subr.bf16.mxu1 %v2113_v0 }
0x2129   :  { %1896 = vmatpush3.bf16.msra.mxu1 %v2383_v63 }
0x21f7   :  { %v1364_v34 = vpop.f32.mrb[32].mxu1 }
0x21f8   :  { %v1370_v35 = vadd.f32 %v1364_v34, %v933_v33  ;;  %v1883_v36 = vpop.f32.mrb[33].mxu1 }
0x21f9   :  { %v1367_v11 = vpop.f32.mrb[34].mxu1 }
0x21fa   :  { %2034 = vtanh.f32 %v1370_v35  ;;  %v1884_v37 = vpop.f32.mrb[35].mxu1  ;;  %v1679_v62 = vmul.f32 -1.442695, %v1370_v35  ;;  %v1684_v35 = vld [vmem:[%s2557_s8] ss:$0 sm:$0xff] }
0x21fc   :  { %2036 = vpow2.f32 %v1679_v62 }
0x2204   :  { %v2035_v38 = vpop.eup %2034 }
0x2205   :  { %1380 = vrot.lane.b32.xlu1 %v2035_v38, %s2116_s10 }
0x2206   :  { %v2037_v3 = vpop.eup %2036 }
0x2207   :  { %v1374_v39 = vadd.f32 1.0, %v2037_v3 }
0x2209   :  { %2038 = vrcp.f32 %v1374_v39 }
0x2213   :  { %v2039_v40 = vpop.eup %2038 }
0x2214   :  { %v1378_v24 = vmul.f32 %v2039_v40, %v1315_v25 }
0x2277   :  { %v1381_v42 = vpop.permute.xlu1 %1380 }
0x2278   :  { %v1383_v63 = vmul.f32 %v2039_v40, %v1381_v42 }
0x227a   :  { %1385 = vrot.lane.b32.xlu0 %v1383_v63, %s2116_s10 }
0x22ec   :  { %v1386_v43 = vpop.permute.xlu0 %1385 }
0x22ed   :  { %v1388_v55 = vadd.f32 %v1386_v43, %v1378_v24 }
0x22ef   :  { %2040 = vtanh.f32 %v1388_v55 }
0x22f9   :  { %v2041_v44 = vpop.eup %2040 }
0x22fa   :  { %1391 = vrot.lane.b32.xlu1 %v2041_v44, %s2116_s10 }
0x236c   :  { %v1392_v46 = vpop.permute.xlu1 %1391 }
0x236d   :  { %v1394_v47 = vmul.f32 %v2039_v40, %v1392_v46 }
0x236f   :  { %v1396_v45 = vpack.c.bf16 %v1394_v47, %v1394_v47 }
0x2371   :  { %1398 = vrot.lane.b32.xlu0 %v1396_v45, %s2111_s19 }
0x23e3   :  { %v1399_v48 = vpop.permute.xlu0 %1398 }
0x23e4   :  { %1890 = vmatmul.mubr.msk.bf16.vlgmr.msra.gmra.mrb[36].mxu0 %vm194_vm2, %v1399_v48 }
0x23e5   :  { %1905 = vmatprep.mubr.msk.bf16.mxu0 %vm2114_vm0, %v2113_v0  ;;  %1902 = vmatpush3.bf16.msra.mxu0 %v1928_v26 }
0x23e6   :  { %1903 = vmatprep.subr.bf16.mxu0 %v2113_v0 }
0x23e9   :  { %1904 = vmatpush3.bf16.msra.mxu0 %v1929_v28 }
0x24b7   :  { %v1437_v20 = vpop.f32.mrb[36].mxu0 }
0x24b8   :  { %v1443_v49 = vadd.f32 %v1437_v20, %v938_v30  ;;  %v1891_v51 = vpop.f32.mrb[37].mxu0 }
0x24b9   :  { %v1440_v52 = vpop.f32.mrb[38].mxu0 }
0x24ba   :  { %2042 = vtanh.f32 %v1443_v49  ;;  %v1892_v54 = vpop.f32.mrb[39].mxu0  ;;  %v1681_v4 = vmul.f32 -1.442695, %v1443_v49 }
0x24bc   :  { %2044 = vpow2.f32 %v1681_v4 }
0x24c4   :  { %v2043_v59 = vpop.eup %2042 }
0x24c5   :  { %1453 = vrot.lane.b32.xlu1 %v2043_v59, %s2116_s10 }
0x24c6   :  { %v2045_v50 = vpop.eup %2044 }
0x24c7   :  { %v1447_v60 = vadd.f32 1.0, %v2045_v50 }
0x24c9   :  { %2046 = vrcp.f32 %v1447_v60 }
0x24d3   :  { %v2047_v10 = vpop.eup %2046 }
0x24d4   :  { %v1451_v7 = vmul.f32 %v2047_v10, %v1388_v55 }
0x2537   :  { %v1454_v53 = vpop.permute.xlu1 %1453 }
0x2538   :  { %v1456_v41 = vmul.f32 %v2047_v10, %v1454_v53 }
0x253a   :  { %1458 = vrot.lane.b32.xlu0 %v1456_v41, %s2116_s10 }
0x25ac   :  { %v1459_v61 = vpop.permute.xlu0 %1458 }
0x25ad   :  { %v1461_v56 = vadd.f32 %v1459_v61, %v1451_v7 }
0x25af   :  { %2048 = vtanh.f32 %v1461_v56 }
0x25b9   :  { %v2049_v1 = vpop.eup %2048 }
0x25ba   :  { %1464 = vrot.lane.b32.xlu1 %v2049_v1, %s2116_s10 }
0x262c   :  { %v1465_v9 = vpop.permute.xlu1 %1464 }
0x262d   :  { %v1467_v12 = vmul.f32 %v2047_v10, %v1465_v9 }
0x262f   :  { %v1469_v6 = vpack.c.bf16 %v1467_v12, %v1467_v12 }
0x2631   :  { %1471 = vrot.lane.b32.xlu0 %v1469_v6, %s2111_s19 }
0x26a3   :  { %v1472_v13 = vpop.permute.xlu0 %1471 }
0x26a4   :  { %1898 = vmatmul.mubr.msk.bf16.vlgmr.msra.gmra.mrb[36].mxu1 %vm194_vm2, %v1472_v13 }
0x2777   :  { %v1510_v15 = vpop.f32.mrb[36].mxu1 }
0x2778   :  { %v1516_v8 = vadd.f32 %v1510_v15, %v941_v14  ;;  %v1899_v16 = vpop.f32.mrb[37].mxu1 }
0x2779   :  { %v1513_v2 = vpop.f32.mrb[38].mxu1 }
0x277a   :  { %2050 = vtanh.f32 %v1516_v8  ;;  %v1900_v18 = vpop.f32.mrb[39].mxu1  ;;  %v1683_v5 = vmul.f32 -1.442695, %v1516_v8 }
0x277c   :  { %2052 = vpow2.f32 %v1683_v5 }
0x2784   :  { %v2051_v19 = vpop.eup %2050 }
0x2785   :  { %1526 = vrot.lane.b32.xlu1 %v2051_v19, %s2116_s10 }
0x2786   :  { %v2053_v27 = vpop.eup %2052 }
0x2787   :  { %v1520_v21 = vadd.f32 1.0, %v2053_v27 }
0x2789   :  { %2054 = vrcp.f32 %v1520_v21 }
0x2793   :  { %v2055_v22 = vpop.eup %2054 }
0x2794   :  { %v1524_v17 = vmul.f32 %v2055_v22, %v1461_v56 }
0x27f7   :  { %v1527_v58 = vpop.permute.xlu1 %1526 }
0x27f8   :  { %v1529_v57 = vmul.f32 %v2055_v22, %v1527_v58 }
0x27fa   :  { %1531 = vrot.lane.b32.xlu0 %v1529_v57, %s2116_s10 }
0x286c   :  { %v1532_v23 = vpop.permute.xlu0 %1531 }
0x286d   :  { %v1534_v25 = vadd.f32 %v1532_v23, %v1524_v17 }
0x286f   :  { %2056 = vtanh.f32 %v1534_v25 }
0x2879   :  { %v2057_v29 = vpop.eup %2056 }
0x287a   :  { %1537 = vrot.lane.b32.xlu1 %v2057_v29, %s2116_s10 }
0x28ec   :  { %v1538_v31 = vpop.permute.xlu1 %1537 }
0x28ed   :  { %v1540_v32 = vmul.f32 %v2055_v22, %v1538_v31 }
0x28ef   :  { %v1541_v33 = vpack.c.bf16 %v1540_v32, %v1540_v32 }
0x28f1   :  { %1554 = vrot.lane.b32.xlu0 %v1541_v33, %s2111_s19  ;;  %s2084_s19 = scalar_lea.vmem %s1625_s1, 128 }
0x28f2   :  { %p2085_p8 = scmp.ne.s32.totalorder %s1625_s1, %s2084_s19  ;;  %p2090_p10 = scmp.lt.s32.totalorder %s2084_s19, %s2084_s19 }
0x28f4   :  { %p2091_p11 = por %p2090_p10, %p2089_p9 }
0x28f6   :  { %p2092_p12 = pnand %p2091_p11, %p2085_p8 }
0x2963   :  { %v1555_v34 = vpop.permute.xlu0 %1554 }
0x2964   :  { %1906 = vmatmul.mubr.msk.bf16.vlgmr.msra.gmra.mrb[40].mxu0 %vm194_vm2, %v1555_v34 }
0x2a37   :  { %v1605_v36 = vpop.f32.mrb[40].mxu0 }
0x2a38   :  { %v1606_v11 = vadd.f32 %v1684_v35, %v1605_v36  ;;  %v1907_v37 = vpop.f32.mrb[41].mxu0 }
0x2a39   :  { %v1608_v0 = vpop.f32.mrb[42].mxu0 }
0x2a3a   :  { %v1688_v38 = vmul.f32 -1.442695, %v1606_v11  ;;  %v1908_v62 = vpop.f32.mrb[43].mxu0 }
0x2a3c   :  { %2058 = vpow2.f32 %v1688_v38 }
0x2a46   :  { %v2059_v3 = vpop.eup %2058 }
0x2a47   :  { %v1614_v39 = vadd.f32 1.0, %v2059_v3 }
0x2a49   :  { %2060 = vrcp.f32 %v1614_v39 }
0x2a53   :  { %v2061_v40 = vpop.eup %2060 }
0x2a54   :  { %1617 = vst [vmem:[#allocation7] sm:$0xff] %v2061_v40 }
0x2a55   :  { %2095 = shalt.err (!%p2092_p12)
}
0x2a56   :  { %s2096_s28 = scalar_lea.hbm %s2558_s9, 128 }
0x2a57   :  { %p2097_p13 = scmp.ne.s32.totalorder %s2558_s9, %s2096_s28  ;;  %p2100_p0 = scmp.lt.u32.totalorder %s2096_s28, %s2558_s9 }
0x2a59   :  { %p2102_p1 = pnand %p2100_p0, %p2097_p13 }
0x2a5b   :  { %2105 = shalt.err (!%p2102_p1)
}
0x2a5c   :  { %1627 = dma.vmem_to_hbm [thread:$0]  %s1625_s1, 128, %s2558_s9, [#allocation6]  }
0x2a5d   :  { %2108 = dma.done.wait [#allocation6], 128  }
0x2a5e   :  { %2109 = vsyncadd [#allocation6], 4294967168 }
0x2a5f   :  { %1631 = vsyncpa [#allocation5], 1 }
0x2a60   :  { %1632 = vsyncpa [#allocation6], 1 }

</bundles_post_ra>
